<compile_context>
chip_gen: v7x
topology: tpu7x:2x2x1
jax: 0.10.0
libtpu: 0.0.40
codegen_flags: <defaults>
</compile_context>

<pallas_src>
import functools

import jax
import jax.numpy as jnp
from jax.experimental import pallas as pl
from jax.experimental.pallas import tpu as pltpu


def _round_up(x, m):
    return ((x + m - 1) // m) * m


def _sensitivity_kernel(k_m, k_o, se_tot, so_tot, g,
                        xm_ref, xo_ref, w_ref, aux_ref, out_ref):
    f32 = jnp.float32
    bf16 = jnp.bfloat16

    # Packed weights (bf16, block-diagonal for the per-server layers).
    w1 = w_ref[0]                              # (rp, cp)
    w1m = w1[0:k_m, 0:se_tot]                  # mdt-feature rows of layer 1
    w1o = w1[k_m:k_m + k_o, 0:se_tot]          # ost-feature rows of layer 1
    w2 = w_ref[1][0:se_tot, 0:so_tot]          # block-diag layer 2
    wb = w_ref[2][0:so_tot, 0:g]               # fc_bridge (single dense dot)

    aux = aux_ref[...]                         # (8, cp) f32: biases + fc_out
    b1 = aux[0:1, 0:se_tot]
    b2 = aux[1:2, 0:so_tot]
    bb = aux[2:3, 0:g]
    wout = aux[3:4, 0:g]
    bout = aux[4:5, 0:1]

    xm = xm_ref[...].astype(bf16)              # (tb, k_m)
    xo = xo_ref[...].astype(bf16)              # (tb, k_o)

    # Layer 1: all servers at once via block-diagonal weights.
    h1 = jnp.dot(xm, w1m, preferred_element_type=f32)
    h1 = h1 + jnp.dot(xo, w1o, preferred_element_type=f32)
    h1 = jnp.maximum(h1 + b1, 0.0)             # (tb, se_tot)

    # Layer 2: block-diagonal -> concatenated per-server outputs (== torch.cat).
    h2 = jnp.maximum(
        jnp.dot(h1.astype(bf16), w2, preferred_element_type=f32) + b2, 0.0)

    # fc_bridge: one dense (tb, so_tot) @ (so_tot, g) dot.
    h3 = jnp.maximum(
        jnp.dot(h2.astype(bf16), wb, preferred_element_type=f32) + bb, 0.0)

    # fc_out (N == 1): VPU multiply-reduce; (tb, 1) result stores w/o relayout.
    y = jnp.sum(h3 * wout, axis=-1, keepdims=True) + bout
    out_ref[...] = jax.nn.sigmoid(y)           # output_size == 1 -> Sigmoid


def pack_params(params, n_mdt, n_ost):
    """One-time packing: block-diagonal weights (bf16) + fused bias ref (f32)."""
    (w1m, b1m, w2m, b2m, w1o, b1o, w2o, b2o, wb, bb, wout, bout) = params
    w_mdt, se = w1m.shape
    w_ost = w1o.shape[0]
    so = w2m.shape[1]
    g = bb.shape[1]
    n_tot = n_mdt + n_ost
    k_m, k_o = n_mdt * w_mdt, n_ost * w_ost
    se_tot, so_tot = n_tot * se, n_tot * so

    # Layer-1 block-diagonal: rows = [mdt features..., ost features...],
    # cols = per-server embedding slots (mdt servers first, then ost).
    w1_blk = jnp.zeros((k_m + k_o, se_tot), jnp.float32)
    for n in range(n_mdt):
        w1_blk = w1_blk.at[n * w_mdt:(n + 1) * w_mdt, n * se:(n + 1) * se].set(w1m)
    for n in range(n_ost):
        r, c = k_m + n * w_ost, (n_mdt + n) * se
        w1_blk = w1_blk.at[r:r + w_ost, c:c + se].set(w1o)

    # Layer-2 block-diagonal: per-server (se -> so) blocks.
    w2_blk = jnp.zeros((se_tot, so_tot), jnp.float32)
    for n in range(n_mdt):
        w2_blk = w2_blk.at[n * se:(n + 1) * se, n * so:(n + 1) * so].set(w2m)
    for n in range(n_ost):
        i = n_mdt + n
        w2_blk = w2_blk.at[i * se:(i + 1) * se, i * so:(i + 1) * so].set(w2o)

    rp = _round_up(max(k_m + k_o, se_tot, so_tot), 16)   # bf16 sublane packing
    cp = _round_up(max(se_tot, so_tot, g), 128)          # lane width
    w_pack = jnp.zeros((3, rp, cp), jnp.bfloat16)
    w_pack = w_pack.at[0, :k_m + k_o, :se_tot].set(w1_blk.astype(jnp.bfloat16))
    w_pack = w_pack.at[1, :se_tot, :so_tot].set(w2_blk.astype(jnp.bfloat16))
    w_pack = w_pack.at[2, :so_tot, :g].set(wb.astype(jnp.bfloat16))

    b1_blk = jnp.concatenate([jnp.tile(b1m[0], n_mdt), jnp.tile(b1o[0], n_ost)])
    b2_blk = jnp.concatenate([jnp.tile(b2m[0], n_mdt), jnp.tile(b2o[0], n_ost)])
    aux = jnp.zeros((8, cp), jnp.float32)
    aux = aux.at[0, :se_tot].set(b1_blk)
    aux = aux.at[1, :so_tot].set(b2_blk)
    aux = aux.at[2, :g].set(bb[0])
    aux = aux.at[3, :g].set(wout[:, 0])
    aux = aux.at[4, 0].set(bout.reshape(-1)[0])

    dims = (int(k_m), int(k_o), int(se_tot), int(so_tot), int(g))
    return w_pack, aux, dims


def sensitivity_forward(mdt, ost, w_pack, aux, *, dims, max_tb=1024):
    """mdt: (B, n_mdt, w_mdt) f32, ost: (B, n_ost, w_ost) f32 -> (B, 1) f32."""
    k_m, k_o, se_tot, so_tot, g = dims
    b = mdt.shape[0]
    assert mdt.shape[1] * mdt.shape[2] == k_m
    assert ost.shape[1] * ost.shape[2] == k_o

    # Layout-preserving (free) collapse of the per-server feature axes.
    xm = mdt.reshape(b, k_m)
    xo = ost.reshape(b, k_o)

    max_tb = max(128, (int(max_tb) // 128) * 128)
    if b <= max_tb:
        # One whole-batch tile: no padding, no host copies, 1 grid step
        # (preferred on single-TC v5e/v6e; also right on v7x at small/medium B
        # where the ~0.35us/step overhead beats splitting a tiny body).
        tb, b_eff = b, b
    else:
        # Large batches: split into max_tb tiles ("parallel" grid axis feeds
        # both v7x TensorCores). Pad at most 7 rows so tile rows stay
        # 8-aligned; a partial last tile is handled by Pallas edge masking.
        pad = (-b) % 8
        if pad:
            xm = jnp.pad(xm, ((0, pad), (0, 0)))
            xo = jnp.pad(xo, ((0, pad), (0, 0)))
        tb, b_eff = max_tb, b + pad

    num_tiles = pl.cdiv(b_eff, tb)

    flops = 2 * b_eff * (k_m * se_tot + k_o * se_tot + se_tot * so_tot
                         + so_tot * g + g)
    bytes_accessed = (4 * b_eff * (k_m + k_o + 1)
                      + 2 * int(w_pack.size) + 4 * int(aux.size))

    kernel = functools.partial(_sensitivity_kernel, k_m, k_o, se_tot, so_tot, g)

    out = pl.pallas_call(
        kernel,
        out_shape=jax.ShapeDtypeStruct((b_eff, 1), jnp.float32),
        grid=(num_tiles,),
        in_specs=[
            pl.BlockSpec((tb, k_m), lambda i: (i, 0)),
            pl.BlockSpec((tb, k_o), lambda i: (i, 0)),
            pl.BlockSpec(w_pack.shape, lambda i: (0, 0, 0)),   # resident weights
            pl.BlockSpec(aux.shape, lambda i: (0, 0)),         # resident biases
        ],
        out_specs=pl.BlockSpec((tb, 1), lambda i: (i, 0)),
        compiler_params=pltpu.CompilerParams(
            dimension_semantics=("parallel",)),
        cost_estimate=pl.CostEstimate(flops=int(flops),
                                      transcendentals=int(2 * b_eff),
                                      bytes_accessed=int(bytes_accessed)),
    )(xm, xo, w_pack, aux)

    return out[:b] if b_eff != b else out


def init_params(key, w_mdt, w_ost, n_mdt, n_ost,
                server_emb=16, server_out=8, global_hidden=16, output_size=1):
    """Deterministic PyTorch-Linear-style init (uniform +- 1/sqrt(fan_in))."""
    ks = jax.random.split(key, 6)

    def lin(k, fan_in, fan_out):
        kw, kb = jax.random.split(k)
        bound = 1.0 / (fan_in ** 0.5)
        w = jax.random.uniform(kw, (fan_in, fan_out), jnp.float32, -bound, bound)
        bvec = jax.random.uniform(kb, (1, fan_out), jnp.float32, -bound, bound)
        return w, bvec

    w1m, b1m = lin(ks[0], w_mdt, server_emb)            # mdt_fc
    w2m, b2m = lin(ks[1], server_emb, server_out)       # mdt_fc_out
    w1o, b1o = lin(ks[2], w_ost, server_emb)            # ost_fc
    w2o, b2o = lin(ks[3], server_emb, server_out)       # ost_fc_out
    wb, bb = lin(ks[4], (n_mdt + n_ost) * server_out, global_hidden)  # fc_bridge
    wout, bout = lin(ks[5], global_hidden, output_size)               # fc_out
    return (w1m, b1m, w2m, b2m, w1o, b1o, w2o, b2o, wb, bb, wout, bout)


def reference_forward(mdt, ost, params, *, n_mdt, n_ost):
    """Pure-JAX f32 mirror of the PyTorch forward, for correctness checking."""
    (w1m, b1m, w2m, b2m, w1o, b1o, w2o, b2o, wb, bb, wout, bout) = params
    so = w2m.shape[1]
    relu = lambda x: jnp.maximum(x, 0.0)

    m = mdt.reshape(-1, mdt.shape[-1])
    m = relu(relu(m @ w1m + b1m) @ w2m + b2m).reshape(-1, n_mdt * so)
    o = ost.reshape(-1, ost.shape[-1])
    o = relu(relu(o @ w1o + b1o) @ w2o + b2o).reshape(-1, n_ost * so)

    x = jnp.concatenate([m, o], axis=1)
    x = relu(x @ wb + bb)
    return jax.nn.sigmoid(x @ wout + bout)


if __name__ == "__main__":
    # Module configuration (matches SensitivityModel.__init__ contract).
    devices = {"mdt": ["mdt0", "mdt1"], "ost": ["ost0", "ost1", "ost2"]}
    features = {"stats": ["s0", "s1", "s2"],
                "mdt_trace": ["m0", "m1", "m2", "m3", "m4"],
                "ost_trace": ["o0", "o1", "o2", "o3", "o4", "o5", "o6", "o7", "o8"]}
    n_mdt, n_ost = len(devices["mdt"]), len(devices["ost"])
    w_mdt = len(features["stats"]) + len(features["mdt_trace"])    # 8
    w_ost = len(features["stats"]) + len(features["ost_trace"])    # 12
    batch = 512

    key = jax.random.PRNGKey(0)
    k_mdt, k_ost, k_par = jax.random.split(key, 3)
    mdt = jax.random.normal(k_mdt, (batch, n_mdt, w_mdt), jnp.float32)
    ost = jax.random.normal(k_ost, (batch, n_ost, w_ost), jnp.float32)
    params = init_params(k_par, w_mdt, w_ost, n_mdt, n_ost)

    # One-time parameter packing (block-diagonal weights + fused bias ref).
    w_pack, aux, dims = pack_params(params, n_mdt, n_ost)
    fwd = jax.jit(sensitivity_forward, static_argnames=("dims", "max_tb"))

    # bf16 matmul operands (f32 accumulation) -> tolerance relaxed vs pure f32.
    tol = dict(atol=2e-2, rtol=0.0)

    # Single-tile path (whole batch in one grid step).
    out = jax.block_until_ready(fwd(mdt, ost, w_pack, aux, dims=dims))
    ref = reference_forward(mdt, ost, params, n_mdt=n_mdt, n_ost=n_ost)
    assert out.shape == (batch, 1)
    assert jnp.allclose(out, ref, **tol)

    # Multi-tile path (2 grid steps of tb=256, exercises the pipelined grid).
    out2 = jax.block_until_ready(
        fwd(mdt, ost, w_pack, aux, dims=dims, max_tb=256))
    assert jnp.allclose(out2, ref, **tol)

    # Ragged batch (not a multiple of 8): single full-batch tile, no padding.
    out3 = jax.block_until_ready(fwd(mdt[:300], ost[:300], w_pack, aux, dims=dims))
    ref3 = reference_forward(mdt[:300], ost[:300], params, n_mdt=n_mdt, n_ost=n_ost)
    assert out3.shape == (300, 1)
    assert jnp.allclose(out3, ref3, **tol)

    print("KERNEL_OK")
</pallas_src>

<mosaic_0001>
module attributes {stable_mosaic.version = 11 : i64} {
  func.func @_sensitivity_kernel(%arg0: i32, %arg1: memref<512x16xf32, #tpu.memory_space<vmem>>, %arg2: memref<512x36xf32, #tpu.memory_space<vmem>>, %arg3: memref<3x80x128xbf16, #tpu.memory_space<vmem>>, %arg4: memref<8x128xf32, #tpu.memory_space<vmem>>, %arg5: memref<512x1xf32, #tpu.memory_space<vmem>>) attributes {dimension_semantics = [#tpu.dimension_semantics<parallel>], iteration_bounds = array<i64: 1>, scalar_prefetch = 0 : i64, scratch_operands = 0 : i64, tpu.core_type = #tpu.core_type<tc>, window_params = [{transform_indices = @transform_0, window_bounds = array<i64: 512, 16>}, {transform_indices = @transform_1, window_bounds = array<i64: 512, 36>}, {pipeline_mode = #tpu.pipeline_mode<synchronous>, transform_indices = @transform_2, window_bounds = array<i64: 3, 80, 128>}, {pipeline_mode = #tpu.pipeline_mode<synchronous>, transform_indices = @transform_3, window_bounds = array<i64: 8, 128>}, {transform_indices = @transform_4, window_bounds = array<i64: 512, 1>}]} {
    %c0 = arith.constant 0 : index
    %c0_0 = arith.constant 0 : index
    %c0_1 = arith.constant 0 : index
    %0 = vector.load %arg3[%c0, %c0_0, %c0_1] : memref<3x80x128xbf16, #tpu.memory_space<vmem>>, vector<1x80x128xbf16>
    %1 = vector.shape_cast %0 : vector<1x80x128xbf16> to vector<80x128xbf16>
    %2 = vector.extract_strided_slice %1 {offsets = [0, 0], sizes = [16, 80], strides = [1, 1]} : vector<80x128xbf16> to vector<16x80xbf16>
    %3 = vector.extract_strided_slice %1 {offsets = [16, 0], sizes = [36, 80], strides = [1, 1]} : vector<80x128xbf16> to vector<36x80xbf16>
    %c1 = arith.constant 1 : index
    %c0_2 = arith.constant 0 : index
    %c0_3 = arith.constant 0 : index
    %4 = vector.load %arg3[%c1, %c0_2, %c0_3] : memref<3x80x128xbf16, #tpu.memory_space<vmem>>, vector<1x80x128xbf16>
    %5 = vector.shape_cast %4 : vector<1x80x128xbf16> to vector<80x128xbf16>
    %6 = vector.extract_strided_slice %5 {offsets = [0, 0], sizes = [80, 40], strides = [1, 1]} : vector<80x128xbf16> to vector<80x40xbf16>
    %c2 = arith.constant 2 : index
    %c0_4 = arith.constant 0 : index
    %c0_5 = arith.constant 0 : index
    %7 = vector.load %arg3[%c2, %c0_4, %c0_5] : memref<3x80x128xbf16, #tpu.memory_space<vmem>>, vector<1x80x128xbf16>
    %8 = vector.shape_cast %7 : vector<1x80x128xbf16> to vector<80x128xbf16>
    %9 = vector.extract_strided_slice %8 {offsets = [0, 0], sizes = [40, 16], strides = [1, 1]} : vector<80x128xbf16> to vector<40x16xbf16>
    %c0_6 = arith.constant 0 : index
    %c0_7 = arith.constant 0 : index
    %10 = vector.load %arg4[%c0_6, %c0_7] : memref<8x128xf32, #tpu.memory_space<vmem>>, vector<8x128xf32>
    %11 = vector.extract_strided_slice %10 {offsets = [0, 0], sizes = [1, 80], strides = [1, 1]} : vector<8x128xf32> to vector<1x80xf32>
    %12 = vector.extract_strided_slice %10 {offsets = [1, 0], sizes = [1, 40], strides = [1, 1]} : vector<8x128xf32> to vector<1x40xf32>
    %13 = vector.extract_strided_slice %10 {offsets = [2, 0], sizes = [1, 16], strides = [1, 1]} : vector<8x128xf32> to vector<1x16xf32>
    %14 = vector.extract_strided_slice %10 {offsets = [3, 0], sizes = [1, 16], strides = [1, 1]} : vector<8x128xf32> to vector<1x16xf32>
    %15 = vector.extract_strided_slice %10 {offsets = [4, 0], sizes = [1, 1], strides = [1, 1]} : vector<8x128xf32> to vector<1x1xf32>
    %c0_8 = arith.constant 0 : index
    %c0_9 = arith.constant 0 : index
    %16 = vector.load %arg1[%c0_8, %c0_9] : memref<512x16xf32, #tpu.memory_space<vmem>>, vector<512x16xf32>
    %17 = arith.truncf %16 : vector<512x16xf32> to vector<512x16xbf16>
    %c0_10 = arith.constant 0 : index
    %c0_11 = arith.constant 0 : index
    %18 = vector.load %arg2[%c0_10, %c0_11] : memref<512x36xf32, #tpu.memory_space<vmem>>, vector<512x36xf32>
    %19 = arith.truncf %18 : vector<512x36xf32> to vector<512x36xbf16>
    %cst = arith.constant dense<0.000000e+00> : vector<512x80xf32>
    %20 = tpu.matmul %17, %2, %cst {dimension_numbers = #tpu.dot_dimension_numbers<[1], [0], [0], [1], [0, 0, 1, 1], [], []>} : vector<512x16xbf16>, vector<16x80xbf16>, vector<512x80xf32> -> vector<512x80xf32>
    %cst_12 = arith.constant dense<0.000000e+00> : vector<512x80xf32>
    %21 = tpu.matmul %19, %3, %cst_12 {dimension_numbers = #tpu.dot_dimension_numbers<[1], [0], [0], [1], [0, 0, 1, 1], [], []>} : vector<512x36xbf16>, vector<36x80xbf16>, vector<512x80xf32> -> vector<512x80xf32>
    %22 = arith.addf %20, %21 : vector<512x80xf32>
    %23 = vector.broadcast %11 : vector<1x80xf32> to vector<512x80xf32>
    %24 = arith.addf %22, %23 : vector<512x80xf32>
    %cst_13 = arith.constant 0.000000e+00 : f32
    %25 = vector.broadcast %cst_13 : f32 to vector<512x80xf32>
    %26 = arith.maximumf %24, %25 : vector<512x80xf32>
    %27 = arith.truncf %26 : vector<512x80xf32> to vector<512x80xbf16>
    %cst_14 = arith.constant dense<0.000000e+00> : vector<512x40xf32>
    %28 = tpu.matmul %27, %6, %cst_14 {dimension_numbers = #tpu.dot_dimension_numbers<[1], [0], [0], [1], [0, 0, 1, 1], [], []>} : vector<512x80xbf16>, vector<80x40xbf16>, vector<512x40xf32> -> vector<512x40xf32>
    %29 = vector.broadcast %12 : vector<1x40xf32> to vector<512x40xf32>
    %30 = arith.addf %28, %29 : vector<512x40xf32>
    %cst_15 = arith.constant 0.000000e+00 : f32
    %31 = vector.broadcast %cst_15 : f32 to vector<512x40xf32>
    %32 = arith.maximumf %30, %31 : vector<512x40xf32>
    %33 = arith.truncf %32 : vector<512x40xf32> to vector<512x40xbf16>
    %cst_16 = arith.constant dense<0.000000e+00> : vector<512x16xf32>
    %34 = tpu.matmul %33, %9, %cst_16 {dimension_numbers = #tpu.dot_dimension_numbers<[1], [0], [0], [1], [0, 0, 1, 1], [], []>} : vector<512x40xbf16>, vector<40x16xbf16>, vector<512x16xf32> -> vector<512x16xf32>
    %35 = vector.broadcast %13 : vector<1x16xf32> to vector<512x16xf32>
    %36 = arith.addf %34, %35 : vector<512x16xf32>
    %cst_17 = arith.constant 0.000000e+00 : f32
    %37 = vector.broadcast %cst_17 : f32 to vector<512x16xf32>
    %38 = arith.maximumf %36, %37 : vector<512x16xf32>
    %39 = vector.broadcast %14 : vector<1x16xf32> to vector<512x16xf32>
    %40 = arith.mulf %38, %39 : vector<512x16xf32>
    %cst_18 = arith.constant dense<0.000000e+00> : vector<512xf32>
    %41 = vector.multi_reduction <add>, %40, %cst_18 [1] : vector<512x16xf32> to vector<512xf32>
    %42 = vector.shape_cast %41 : vector<512xf32> to vector<512x1xf32>
    %43 = vector.broadcast %15 : vector<1x1xf32> to vector<512x1xf32>
    %44 = arith.addf %42, %43 : vector<512x1xf32>
    %45 = arith.negf %44 : vector<512x1xf32>
    %46 = math.exp %45 : vector<512x1xf32>
    %cst_19 = arith.constant 1.000000e+00 : f32
    %47 = vector.broadcast %cst_19 : f32 to vector<512x1xf32>
    %48 = arith.addf %47, %46 : vector<512x1xf32>
    %49 = arith.divf %47, %48 : vector<512x1xf32>
    %c0_20 = arith.constant 0 : index
    %c0_21 = arith.constant 0 : index
    %50 = vector.load %arg5[%c0_20, %c0_21] : memref<512x1xf32, #tpu.memory_space<vmem>>, vector<512x1xf32>
    tpu.vector_store %arg5[%c0_20, %c0_21], %49 {strides = array<i32>} : memref<512x1xf32, #tpu.memory_space<vmem>>, vector<512x1xf32>,
    return
  }
  func.func @transform_0(%arg0: i32) -> (i32, i32) {
    %c0_i32 = arith.constant 0 : i32
    %c0_i32_0 = arith.constant 0 : i32
    return %arg0, %c0_i32 : i32, i32
  }
  func.func @transform_1(%arg0: i32) -> (i32, i32) {
    %c0_i32 = arith.constant 0 : i32
    %c0_i32_0 = arith.constant 0 : i32
    return %arg0, %c0_i32 : i32, i32
  }
  func.func @transform_2(%arg0: i32) -> (i32, i32, i32) {
    %c0_i32 = arith.constant 0 : i32
    %c0_i32_0 = arith.constant 0 : i32
    %c0_i32_1 = arith.constant 0 : i32
    %c0_i32_2 = arith.constant 0 : i32
    return %c0_i32, %c0_i32_0, %c0_i32_1 : i32, i32, i32
  }
  func.func @transform_3(%arg0: i32) -> (i32, i32) {
    %c0_i32 = arith.constant 0 : i32
    %c0_i32_0 = arith.constant 0 : i32
    %c0_i32_1 = arith.constant 0 : i32
    return %c0_i32, %c0_i32_0 : i32, i32
  }
  func.func @transform_4(%arg0: i32) -> (i32, i32) {
    %c0_i32 = arith.constant 0 : i32
    %c0_i32_0 = arith.constant 0 : i32
    return %arg0, %c0_i32 : i32, i32
  }
}

</mosaic_0001>

<bundles_post_ra>
// kernel: sensitivity_forward.1
= control target key start
LH: loop header
LB: loop body
LE: loop exit
PB: predicated region body
PF: predicated region fallthrough
CT: control target
= control target key end

     0   :  { %vm250_vm0 = vcmask 293888   ;;  %vm347_vm1 = vcmask 1041408   ;;  %vm646_vm2 = vcmask 130048   ;;  %vm1230_vm3 = vcmask 654336   ;;  %s5185_s2 = inlined_call_operand.vmem [shape: bf16[3,80,128], index: 2, kind: input, shape index: {}]   ;;  %s5186_s1 = inlined_call_operand.vmem [shape: f32[512,36], index: 1, kind: input, shape index: {}]   ;;  %s5187_s0 = inlined_call_operand.vmem [shape: f32[512,16], index: 0, kind: input, shape index: {}]   ;;  %s5188_s3 = inlined_call_operand.vmem [shape: f32[8,128], index: 3, kind: input, shape index: {}]   ;;  %s5189_s4 = inlined_call_operand.vmem [shape: f32[512,1], index: 4, kind: output, shape index: {}]  }
   0x1   :  { %v3671_v0 = vld [vmem:[%s5185_s2 + $0x8] sm:$0xff]   ;;  %v3672_v1 = vld [vmem:[%s5185_s2 + $0x10] sm:$0xff]   ;;  %v139_v2 = vld [vmem:[%s5186_s1] sm:$0xff]  ;;  %vm1828_vm4 = vcmask 1043456   ;;  %vm1731_vm5 = vcmask 326656   ;;  %vm2897_vm6 = vcmask 7168  }
   0x2   :  { %3325 = vmatprep.subr.bf16.mxu0 %v3671_v0  ;;  %v140_v3 = vld [vmem:[%s5186_s1 + $0x8] sm:$0xff]  ;;  %v3673_v4 = vld [vmem:[%s5185_s2 + $0x18] ss:$0 sps:$4 sm:$0xff]   ;;  %v141_v6 = vld [vmem:[%s5186_s1 + $0x10] sm:$0xff] }
   0x3   :  { %3326 = vmatpush3.bf16.msra.mxu0 %v3671_v0  ;;  %v203_v5 = vpack.c.bf16 %v140_v3, %v139_v2  ;;  %v142_v7 = vld [vmem:[%s5186_s1 + $0x18] sm:$0xff]  ;;  %v349_v8 = vsel %vm347_vm1, %v3673_v4, 0  ;;  %v3674_v9 = vld [vmem:[%s5185_s2] sm:$0xff]   ;;  %v144_v11 = vld [vmem:[%s5186_s1 + $0x28] sm:$0xff] }
   0x4   :  { %3327 = vmatprep.subr.bf16.mxu0 %v3672_v1  ;;  %v143_v10 = vld [vmem:[%s5186_s1 + $0x20] sm:$0xff]  ;;  %v204_v12 = vpack.c.bf16 %v142_v7, %v141_v6  ;;  %v145_v14 = vld [vmem:[%s5186_s1 + $0x30] sm:$0xff]  ;;  %v146_v15 = vld [vmem:[%s5186_s1 + $0x38] sm:$0xff] }
   0x5   :  { %3331 = vmatprep.mubr.msk.bf16.mxu0 %vm250_vm0, %v203_v5  ;;  %v205_v13 = vpack.c.bf16 %v144_v11, %v143_v10  ;;  %v147_v16 = vld [vmem:[%s5186_s1 + $0x40] sm:$0xff]  ;;  %v148_v17 = vld [vmem:[%s5186_s1 + $0x48] sm:$0xff]  ;;  %v206_v18 = vpack.c.bf16 %v146_v15, %v145_v14  ;;  %v149_v20 = vld [vmem:[%s5186_s1 + $0x50] sm:$0xff] }
   0x6   :  { %v207_v19 = vpack.c.bf16 %v148_v17, %v147_v16  ;;  %v150_v21 = vld [vmem:[%s5186_s1 + $0x58] sm:$0xff]  ;;  %v151_v22 = vld [vmem:[%s5186_s1 + $0x60] sm:$0xff]  ;;  %v152_v23 = vld [vmem:[%s5186_s1 + $0x68] sm:$0xff] }
   0x7   :  { %3328 = vmatpush3.bf16.msra.mxu0 %v3672_v1  ;;  %v208_v24 = vpack.c.bf16 %v150_v21, %v149_v20  ;;  %v209_v25 = vpack.c.bf16 %v152_v23, %v151_v22  ;;  %v153_v26 = vld [vmem:[%s5186_s1 + $0x70] sm:$0xff]  ;;  %v154_v27 = vld [vmem:[%s5186_s1 + $0x78] sm:$0xff]  ;;  %v155_v28 = vld [vmem:[%s5186_s1 + $0x80] sm:$0xff] }
   0x8   :  { %3669 = vmatprep.subr.msk.bf16.mxu0 %vm347_vm1, %v3673_v4  ;;  %v156_v29 = vld [vmem:[%s5186_s1 + $0x88] sm:$0xff]  ;;  %v210_v30 = vpack.c.bf16 %v154_v27, %v153_v26  ;;  %v157_v32 = vld [vmem:[%s5186_s1 + $0x90] sm:$0xff]  ;;  %v158_v33 = vld [vmem:[%s5186_s1 + $0x98] sm:$0xff] }
   0x9   :  { %v211_v31 = vpack.c.bf16 %v156_v29, %v155_v28  ;;  %v159_v34 = vld [vmem:[%s5186_s1 + $0xa0] sm:$0xff]  ;;  %v160_v35 = vld [vmem:[%s5186_s1 + $0xa8] sm:$0xff]  ;;  %v212_v36 = vpack.c.bf16 %v158_v33, %v157_v32  ;;  %v161_v38 = vld [vmem:[%s5186_s1 + $0xb0] sm:$0xff] }
   0xa   :  { %v213_v37 = vpack.c.bf16 %v160_v35, %v159_v34  ;;  %v162_v39 = vld [vmem:[%s5186_s1 + $0xb8] sm:$0xff]  ;;  %v163_v40 = vld [vmem:[%s5186_s1 + $0xc0] sm:$0xff]  ;;  %v164_v41 = vld [vmem:[%s5186_s1 + $0xc8] sm:$0xff] }
   0xb   :  { %3330 = vmatpush3.bf16.msra.mxu0 %v349_v8  ;;  %v214_v42 = vpack.c.bf16 %v162_v39, %v161_v38  ;;  %v215_v43 = vpack.c.bf16 %v164_v41, %v163_v40  ;;  %v165_v44 = vld [vmem:[%s5186_s1 + $0xd0] sm:$0xff]  ;;  %v166_v45 = vld [vmem:[%s5186_s1 + $0xd8] sm:$0xff]  ;;  %v167_v46 = vld [vmem:[%s5186_s1 + $0xe0] sm:$0xff] }
   0xc   :  { %3395 = vmatprep.subr.bf16.mxu0 %v3674_v9  ;;  %v168_v47 = vld [vmem:[%s5186_s1 + $0xe8] sm:$0xff]  ;;  %v216_v48 = vpack.c.bf16 %v166_v45, %v165_v44  ;;  %v169_v50 = vld [vmem:[%s5186_s1 + $0xf0] sm:$0xff]  ;;  %v170_v51 = vld [vmem:[%s5186_s1 + $0xf8] sm:$0xff] }
   0xd   :  { %v217_v49 = vpack.c.bf16 %v168_v47, %v167_v46  ;;  %v171_v52 = vld [vmem:[%s5186_s1 + $0x100] sm:$0xff]  ;;  %v172_v53 = vld [vmem:[%s5186_s1 + $0x108] sm:$0xff]  ;;  %v218_v54 = vpack.c.bf16 %v170_v51, %v169_v50  ;;  %v173_v56 = vld [vmem:[%s5186_s1 + $0x110] sm:$0xff] }
   0xe   :  { %3332 = vmatmul.mubr.msk.bf16.vlgmr.msra.gmra.mrb[0].mxu0 %vm250_vm0, %v204_v12  ;;  %v219_v55 = vpack.c.bf16 %v172_v53, %v171_v52  ;;  %v174_v57 = vld [vmem:[%s5186_s1 + $0x118] sm:$0xff]  ;;  %v175_v58 = vld [vmem:[%s5186_s1 + $0x120] sm:$0xff]  ;;  %v176_v59 = vld [vmem:[%s5186_s1 + $0x128] sm:$0xff] }
   0xf   :  { %3396 = vmatpush3.bf16.msra.mxu0 %v3674_v9  ;;  %3335 = vmatprep.mubr.msk.bf16.mxu0 %vm250_vm0, %v205_v13  ;;  %v220_v60 = vpack.c.bf16 %v174_v57, %v173_v56  ;;  %v221_v61 = vpack.c.bf16 %v176_v59, %v175_v58  ;;  %v177_v62 = vld [vmem:[%s5186_s1 + $0x130] sm:$0xff]  ;;  %v178_v63 = vld [vmem:[%s5186_s1 + $0x138] sm:$0xff]  ;;  %v179_v0 = vld [vmem:[%s5186_s1 + $0x140] sm:$0xff] }
  0x10   :  { %v180_v1 = vld [vmem:[%s5186_s1 + $0x148] sm:$0xff]  ;;  %v222_v2 = vpack.c.bf16 %v178_v63, %v177_v62  ;;  %v181_v4 = vld [vmem:[%s5186_s1 + $0x150] sm:$0xff]  ;;  %v182_v5 = vld [vmem:[%s5186_s1 + $0x158] sm:$0xff] }
  0x11   :  { %v223_v3 = vpack.c.bf16 %v180_v1, %v179_v0  ;;  %v183_v6 = vld [vmem:[%s5186_s1 + $0x160] sm:$0xff]  ;;  %v184_v7 = vld [vmem:[%s5186_s1 + $0x168] sm:$0xff]  ;;  %v224_v8 = vpack.c.bf16 %v182_v5, %v181_v4  ;;  %v185_v10 = vld [vmem:[%s5186_s1 + $0x170] sm:$0xff] }
  0x12   :  { %v225_v9 = vpack.c.bf16 %v184_v7, %v183_v6  ;;  %v186_v11 = vld [vmem:[%s5186_s1 + $0x178] sm:$0xff]  ;;  %v187_v12 = vld [vmem:[%s5186_s1 + $0x180] sm:$0xff]  ;;  %v188_v13 = vld [vmem:[%s5186_s1 + $0x188] sm:$0xff] }
  0x13   :  { %v226_v14 = vpack.c.bf16 %v186_v11, %v185_v10  ;;  %v227_v15 = vpack.c.bf16 %v188_v13, %v187_v12  ;;  %v189_v16 = vld [vmem:[%s5186_s1 + $0x190] sm:$0xff]  ;;  %v190_v17 = vld [vmem:[%s5186_s1 + $0x198] sm:$0xff]  ;;  %v3675_v40 = vld [vmem:[%s5185_s2 + $0x28] sm:$0xff]  }
  0x14   :  { %v228_v20 = vpack.c.bf16 %v190_v17, %v189_v16  ;;  %v193_v22 = vld [vmem:[%s5186_s1 + $0x1b0] sm:$0xff]  ;;  %v194_v23 = vld [vmem:[%s5186_s1 + $0x1b8] sm:$0xff]  ;;  %v47_v44 = vld [vmem:[%s5187_s0 + $0x20] sm:$0xff]  ;;  %3461 = vmatprep.subr.bf16.mxu1 %v3675_v40 }
  0x15   :  { %v230_v26 = vpack.c.bf16 %v194_v23, %v193_v22  ;;  %v197_v28 = vld [vmem:[%s5186_s1 + $0x1d0] sm:$0xff]  ;;  %v198_v29 = vld [vmem:[%s5186_s1 + $0x1d8] sm:$0xff]  ;;  %v48_v45 = vld [vmem:[%s5187_s0 + $0x28] sm:$0xff]  ;;  %3462 = vmatpush3.bf16.msra.mxu1 %v3675_v40 }
  0x16   :  { %3336 = vmatmul.mubr.msk.bf16.gmra.mrb[4].mxu0 %vm250_vm0, %v206_v18  ;;  %v191_v18 = vld [vmem:[%s5186_s1 + $0x1a0] sm:$0xff]  ;;  %v232_v32 = vpack.c.bf16 %v198_v29, %v197_v28  ;;  %v201_v34 = vld [vmem:[%s5186_s1 + $0x1f0] sm:$0xff]  ;;  %v202_v35 = vld [vmem:[%s5186_s1 + $0x1f8] sm:$0xff] }
  0x17   :  { %3339 = vmatprep.mubr.msk.bf16.mxu0 %vm250_vm0, %v207_v19  ;;  %v192_v19 = vld [vmem:[%s5186_s1 + $0x1a8] sm:$0xff]  ;;  %v234_v38 = vpack.c.bf16 %v202_v35, %v201_v34  ;;  %v3676_v41 = vld [vmem:[%s5185_s2 + $0x30] sm:$0xff]   ;;  %v3677_v47 = vld [vmem:[%s5185_s2 + $0x38] sm:$0xff]  }
  0x18   :  { %v229_v21 = vpack.c.bf16 %v192_v19, %v191_v18  ;;  %3463 = vmatprep.subr.bf16.mxu1 %v3676_v41  ;;  %v50_v50 = vld [vmem:[%s5187_s0 + $0x38] sm:$0xff]  ;;  %v51_v51 = vld [vmem:[%s5187_s0 + $0x40] sm:$0xff]  ;;  %v52_v52 = vld [vmem:[%s5187_s0 + $0x48] sm:$0xff] }
  0x19   :  { %3464 = vmatpush3.bf16.msra.mxu1 %v3676_v41  ;;  %v54_v56 = vld [vmem:[%s5187_s0 + $0x58] sm:$0xff]  ;;  %v55_v57 = vld [vmem:[%s5187_s0 + $0x60] sm:$0xff]  ;;  %v56_v58 = vld [vmem:[%s5187_s0 + $0x68] sm:$0xff] }
  0x1a   :  { %3465 = vmatprep.subr.bf16.mxu1 %v3677_v47  ;;  %v58_v62 = vld [vmem:[%s5187_s0 + $0x78] sm:$0xff]  ;;  %v59_v63 = vld [vmem:[%s5187_s0 + $0x80] sm:$0xff]  ;;  %v60_v0 = vld [vmem:[%s5187_s0 + $0x88] sm:$0xff] }
  0x1b   :  { %v62_v4 = vld [vmem:[%s5187_s0 + $0x98] sm:$0xff]  ;;  %v63_v5 = vld [vmem:[%s5187_s0 + $0xa0] sm:$0xff]  ;;  %v64_v6 = vld [vmem:[%s5187_s0 + $0xa8] sm:$0xff] }
  0x1c   :  { %v66_v10 = vld [vmem:[%s5187_s0 + $0xb8] sm:$0xff]  ;;  %v67_v11 = vld [vmem:[%s5187_s0 + $0xc0] sm:$0xff]  ;;  %v68_v12 = vld [vmem:[%s5187_s0 + $0xc8] sm:$0xff] }
  0x1d   :  { %3466 = vmatpush3.bf16.msra.mxu1 %v3677_v47  ;;  %v70_v16 = vld [vmem:[%s5187_s0 + $0xd8] sm:$0xff]  ;;  %v71_v17 = vld [vmem:[%s5187_s0 + $0xe0] sm:$0xff]  ;;  %v72_v18 = vld [vmem:[%s5187_s0 + $0xe8] sm:$0xff] }
  0x1e   :  { %3340 = vmatmul.mubr.msk.bf16.gmra.mrb[8].mxu0 %vm250_vm0, %v208_v24  ;;  %v195_v24 = vld [vmem:[%s5186_s1 + $0x1c0] sm:$0xff]  ;;  %v74_v22 = vld [vmem:[%s5187_s0 + $0xf8] sm:$0xff] }
  0x1f   :  { %3343 = vmatprep.mubr.msk.bf16.mxu0 %vm250_vm0, %v209_v25  ;;  %v196_v25 = vld [vmem:[%s5186_s1 + $0x1c8] sm:$0xff]  ;;  %v75_v23 = vld [vmem:[%s5187_s0 + $0x100] sm:$0xff]  ;;  %v78_v28 = vld [vmem:[%s5187_s0 + $0x118] sm:$0xff] }
  0x20   :  { %v231_v27 = vpack.c.bf16 %v196_v25, %v195_v24  ;;  %v76_v24 = vld [vmem:[%s5187_s0 + $0x108] sm:$0xff]  ;;  %v79_v29 = vld [vmem:[%s5187_s0 + $0x120] sm:$0xff]  ;;  %v82_v34 = vld [vmem:[%s5187_s0 + $0x138] sm:$0xff] }
  0x21   :  { %v83_v35 = vld [vmem:[%s5187_s0 + $0x140] sm:$0xff]  ;;  %v86_v40 = vld [vmem:[%s5187_s0 + $0x158] sm:$0xff] }
  0x22   :  { %v87_v41 = vld [vmem:[%s5187_s0 + $0x160] sm:$0xff] }
  0x23   :  { %v91_v47 = vld [vmem:[%s5187_s0 + $0x180] sm:$0xff] }
  0x26   :  { %3344 = vmatmul.mubr.msk.bf16.gmra.mrb[12].mxu0 %vm250_vm0, %v210_v30  ;;  %v199_v30 = vld [vmem:[%s5186_s1 + $0x1e0] sm:$0xff] }
  0x27   :  { %3347 = vmatprep.mubr.msk.bf16.mxu0 %vm250_vm0, %v211_v31  ;;  %v200_v31 = vld [vmem:[%s5186_s1 + $0x1e8] sm:$0xff] }
  0x28   :  { %v233_v33 = vpack.c.bf16 %v200_v31, %v199_v30  ;;  %v80_v30 = vld [vmem:[%s5187_s0 + $0x128] sm:$0xff] }
  0x2e   :  { %3348 = vmatmul.mubr.msk.bf16.gmra.mrb[16].mxu0 %vm250_vm0, %v212_v36  ;;  %v43_v36 = vld [vmem:[%s5187_s0] sm:$0xff] }
  0x2f   :  { %3351 = vmatprep.mubr.msk.bf16.mxu0 %vm250_vm0, %v213_v37  ;;  %v44_v37 = vld [vmem:[%s5187_s0 + $0x8] sm:$0xff] }
  0x30   :  { %v107_v39 = vpack.c.bf16 %v44_v37, %v43_v36  ;;  %v84_v36 = vld [vmem:[%s5187_s0 + $0x148] sm:$0xff] }
  0x36   :  { %3352 = vmatmul.mubr.msk.bf16.gmra.mrb[20].mxu0 %vm250_vm0, %v214_v42  ;;  %v45_v42 = vld [vmem:[%s5187_s0 + $0x10] sm:$0xff] }
  0x37   :  { %3355 = vmatprep.mubr.msk.bf16.mxu0 %vm250_vm0, %v215_v43  ;;  %v46_v43 = vld [vmem:[%s5187_s0 + $0x18] sm:$0xff] }
  0x38   :  { %v108_v46 = vpack.c.bf16 %v46_v43, %v45_v42  ;;  %v88_v42 = vld [vmem:[%s5187_s0 + $0x168] sm:$0xff] }
  0x3e   :  { %3356 = vmatmul.mubr.msk.bf16.gmra.mrb[24].mxu0 %vm250_vm0, %v216_v48  ;;  %v109_v48 = vpack.c.bf16 %v48_v45, %v47_v44  ;;  %v129_v44 = vpack.c.bf16 %v88_v42, %v87_v41  ;;  %v89_v45 = vld [vmem:[%s5187_s0 + $0x170] sm:$0xff]  ;;  %v3682_v41 = vld [vmem:[%s5185_s2 + $0x60] ss:$0 sps:$4 sm:$0xff]  }
  0x3f   :  { %3359 = vmatprep.mubr.msk.bf16.mxu0 %vm250_vm0, %v217_v49  ;;  %v49_v49 = vld [vmem:[%s5187_s0 + $0x30] sm:$0xff] }
  0x40   :  { %v110_v53 = vpack.c.bf16 %v50_v50, %v49_v49  ;;  %v3678_v50 = vld [vmem:[%s5185_s2 + $0x40] sm:$0xff]  }
  0x41   :  { %3467 = vmatprep.subr.bf16.mxu1 %v3678_v50 }
  0x42   :  { %3468 = vmatpush3.bf16.msra.mxu1 %v3678_v50 }
  0x46   :  { %3360 = vmatmul.mubr.msk.bf16.gmra.mrb[28].mxu0 %vm250_vm0, %v218_v54  ;;  %v111_v54 = vpack.c.bf16 %v52_v52, %v51_v51  ;;  %v3679_v52 = vld [vmem:[%s5185_s2 + $0x48] sm:$0xff]  }
  0x47   :  { %3363 = vmatprep.mubr.msk.bf16.mxu0 %vm250_vm0, %v219_v55  ;;  %v53_v55 = vld [vmem:[%s5187_s0 + $0x50] sm:$0xff]  ;;  %3469 = vmatprep.subr.bf16.mxu1 %v3679_v52 }
  0x48   :  { %v112_v59 = vpack.c.bf16 %v54_v56, %v53_v55  ;;  %v95_v55 = vld [vmem:[%s5187_s0 + $0x1a0] sm:$0xff]  ;;  %v96_v56 = vld [vmem:[%s5187_s0 + $0x1a8] sm:$0xff]  ;;  %3470 = vmatpush3.bf16.msra.mxu1 %v3679_v52 }
  0x4e   :  { %3364 = vmatmul.mubr.msk.bf16.gmra.mrb[32].mxu0 %vm250_vm0, %v220_v60  ;;  %v113_v60 = vpack.c.bf16 %v56_v58, %v55_v57  ;;  %v133_v58 = vpack.c.bf16 %v96_v56, %v95_v55 }
  0x4f   :  { %3367 = vmatprep.mubr.msk.bf16.mxu0 %vm250_vm0, %v221_v61  ;;  %v57_v61 = vld [vmem:[%s5187_s0 + $0x70] sm:$0xff] }
  0x50   :  { %v114_v1 = vpack.c.bf16 %v58_v62, %v57_v61  ;;  %v99_v61 = vld [vmem:[%s5187_s0 + $0x1c0] sm:$0xff]  ;;  %v100_v62 = vld [vmem:[%s5187_s0 + $0x1c8] sm:$0xff] }
  0x56   :  { %3368 = vmatmul.mubr.msk.bf16.gmra.mrb[36].mxu0 %vm250_vm0, %v222_v2  ;;  %v115_v2 = vpack.c.bf16 %v60_v0, %v59_v63  ;;  %v135_v0 = vpack.c.bf16 %v100_v62, %v99_v61 }
  0x57   :  { %3371 = vmatprep.mubr.msk.bf16.mxu0 %vm250_vm0, %v223_v3  ;;  %v61_v3 = vld [vmem:[%s5187_s0 + $0x90] sm:$0xff] }
  0x58   :  { %v116_v7 = vpack.c.bf16 %v62_v4, %v61_v3  ;;  %v103_v3 = vld [vmem:[%s5187_s0 + $0x1e0] sm:$0xff]  ;;  %v104_v4 = vld [vmem:[%s5187_s0 + $0x1e8] sm:$0xff] }
  0x5e   :  { %3372 = vmatmul.mubr.msk.bf16.gmra.mrb[40].mxu0 %vm250_vm0, %v224_v8  ;;  %v117_v8 = vpack.c.bf16 %v64_v6, %v63_v5  ;;  %v137_v6 = vpack.c.bf16 %v104_v4, %v103_v3 }
  0x5f   :  { %3375 = vmatprep.mubr.msk.bf16.mxu0 %vm250_vm0, %v225_v9  ;;  %v65_v9 = vld [vmem:[%s5187_s0 + $0xb0] sm:$0xff] }
  0x60   :  { %v118_v13 = vpack.c.bf16 %v66_v10, %v65_v9  ;;  %v3680_v10 = vld [vmem:[%s5185_s2 + $0x50] sm:$0xff]  }
  0x61   :  { %3535 = vmatprep.subr.bf16.mxu1 %v3680_v10 }
  0x66   :  { %3376 = vmatmul.mubr.msk.bf16.gmra.mrb[44].mxu0 %vm250_vm0, %v226_v14  ;;  %v119_v14 = vpack.c.bf16 %v68_v12, %v67_v11  ;;  %v1032_v11 = vlaneseq }
  0x67   :  { %3379 = vmatprep.mubr.msk.bf16.mxu0 %vm250_vm0, %v227_v15  ;;  %v69_v15 = vld [vmem:[%s5187_s0 + $0xd0] sm:$0xff] }
  0x68   :  { %v120_v19 = vpack.c.bf16 %v70_v16, %v69_v15  ;;  %v4443_v12 = vshrl.u32 %v1032_v11, 7 }
  0x6e   :  { %3380 = vmatmul.mubr.msk.bf16.gmra.mrb[48].mxu0 %vm250_vm0, %v228_v20  ;;  %v121_v20 = vpack.c.bf16 %v72_v18, %v71_v17 }
  0x6f   :  { %3383 = vmatprep.mubr.msk.bf16.mxu0 %vm250_vm0, %v229_v21  ;;  %v73_v21 = vld [vmem:[%s5187_s0 + $0xf0] sm:$0xff] }
  0x70   :  { %v122_v25 = vpack.c.bf16 %v74_v22, %v73_v21 }
  0x76   :  { %3384 = vmatmul.mubr.msk.bf16.gmra.mrb[52].mxu0 %vm250_vm0, %v230_v26  ;;  %v123_v26 = vpack.c.bf16 %v76_v24, %v75_v23 }
  0x77   :  { %3387 = vmatprep.mubr.msk.bf16.mxu0 %vm250_vm0, %v231_v27  ;;  %v77_v27 = vld [vmem:[%s5187_s0 + $0x110] sm:$0xff] }
  0x78   :  { %v124_v31 = vpack.c.bf16 %v78_v28, %v77_v27 }
  0x7e   :  { %3388 = vmatmul.mubr.msk.bf16.gmra.mrb[56].mxu0 %vm250_vm0, %v232_v32  ;;  %v125_v32 = vpack.c.bf16 %v80_v30, %v79_v29 }
  0x7f   :  { %3391 = vmatprep.mubr.msk.bf16.mxu0 %vm250_vm0, %v233_v33  ;;  %v81_v33 = vld [vmem:[%s5187_s0 + $0x130] sm:$0xff] }
  0x80   :  { %v126_v37 = vpack.c.bf16 %v82_v34, %v81_v33  ;;  %v3681_v33 = vld [vmem:[%s5185_s2 + $0x58] sm:$0xff]  }
  0x86   :  { %3392 = vmatmul.mubr.msk.bf16.gmra.mrb[60].mxu0 %vm250_vm0, %v234_v38  ;;  %v127_v38 = vpack.c.bf16 %v84_v36, %v83_v35 }
  0x87   :  { %3397 = vmatprep.mubr.msk.bf16.mxu0 %vm646_vm2, %v107_v39  ;;  %v85_v39 = vld [vmem:[%s5187_s0 + $0x150] sm:$0xff] }
  0x88   :  { %v128_v43 = vpack.c.bf16 %v86_v40, %v85_v39 }
  0x8e   :  { %3398 = vmatmul.mubr.msk.bf16.vlgmr.msra.gmra.mrb[0].mxu0 %vm646_vm2, %v108_v46  ;;  %v90_v46 = vld [vmem:[%s5187_s0 + $0x178] sm:$0xff] }
  0x8f   :  { %3401 = vmatprep.mubr.msk.bf16.mxu0 %vm646_vm2, %v109_v48  ;;  %v92_v48 = vld [vmem:[%s5187_s0 + $0x188] sm:$0xff]  ;;  %v130_v49 = vpack.c.bf16 %v90_v46, %v89_v45 }
  0x90   :  { %v131_v51 = vpack.c.bf16 %v92_v48, %v91_v47 }
  0x96   :  { %3402 = vmatmul.mubr.msk.bf16.gmra.mrb[4].mxu0 %vm646_vm2, %v110_v53  ;;  %v93_v53 = vld [vmem:[%s5187_s0 + $0x190] sm:$0xff] }
  0x97   :  { %3405 = vmatprep.mubr.msk.bf16.mxu0 %vm646_vm2, %v111_v54  ;;  %v94_v54 = vld [vmem:[%s5187_s0 + $0x198] sm:$0xff] }
  0x98   :  { %v132_v57 = vpack.c.bf16 %v94_v54, %v93_v53 }
  0x9e   :  { %3406 = vmatmul.mubr.msk.bf16.gmra.mrb[8].mxu0 %vm646_vm2, %v112_v59  ;;  %v97_v59 = vld [vmem:[%s5187_s0 + $0x1b0] sm:$0xff] }
  0x9f   :  { %3409 = vmatprep.mubr.msk.bf16.mxu0 %vm646_vm2, %v113_v60  ;;  %v98_v60 = vld [vmem:[%s5187_s0 + $0x1b8] sm:$0xff] }
  0xa0   :  { %v134_v63 = vpack.c.bf16 %v98_v60, %v97_v59 }
  0xa6   :  { %3410 = vmatmul.mubr.msk.bf16.gmra.mrb[12].mxu0 %vm646_vm2, %v114_v1  ;;  %v101_v1 = vld [vmem:[%s5187_s0 + $0x1d0] sm:$0xff] }
  0xa7   :  { %3413 = vmatprep.mubr.msk.bf16.mxu0 %vm646_vm2, %v115_v2  ;;  %v102_v2 = vld [vmem:[%s5187_s0 + $0x1d8] sm:$0xff] }
  0xa8   :  { %v136_v5 = vpack.c.bf16 %v102_v2, %v101_v1 }
  0xae   :  { %3414 = vmatmul.mubr.msk.bf16.gmra.mrb[16].mxu0 %vm646_vm2, %v116_v7  ;;  %v105_v7 = vld [vmem:[%s5187_s0 + $0x1f0] sm:$0xff] }
  0xaf   :  { %3417 = vmatprep.mubr.msk.bf16.mxu0 %vm646_vm2, %v117_v8  ;;  %v106_v8 = vld [vmem:[%s5187_s0 + $0x1f8] sm:$0xff] }
  0xb0   :  { %v138_v9 = vpack.c.bf16 %v106_v8, %v105_v7 }
  0xb6   :  { %3418 = vmatmul.mubr.msk.bf16.gmra.mrb[20].mxu0 %vm646_vm2, %v118_v13  ;;  %v1034_v13 = vsub.s32 0, %v4443_v12 }
  0xb7   :  { %3421 = vmatprep.mubr.msk.bf16.mxu0 %vm646_vm2, %v119_v14  ;;  %v4449_v14 = vld [vmem:[%s5188_s3] sm:$0xff] }
  0xb8   :  { %v4452_v15 = vrot.slane %v4449_v14, %v1034_v13 }
  0xbe   :  { %3422 = vmatmul.mubr.msk.bf16.gmra.mrb[24].mxu0 %vm646_vm2, %v120_v19 }
  0xbf   :  { %3425 = vmatprep.mubr.msk.bf16.mxu0 %vm646_vm2, %v121_v20 }
  0xc6   :  { %3426 = vmatmul.mubr.msk.bf16.gmra.mrb[28].mxu0 %vm646_vm2, %v122_v25 }
  0xc7   :  { %3429 = vmatprep.mubr.msk.bf16.mxu0 %vm646_vm2, %v123_v26 }
  0xce   :  { %3430 = vmatmul.mubr.msk.bf16.gmra.mrb[32].mxu0 %vm646_vm2, %v124_v31 }
  0xcf   :  { %3433 = vmatprep.mubr.msk.bf16.mxu0 %vm646_vm2, %v125_v32 }
  0xd6   :  { %3434 = vmatmul.mubr.msk.bf16.gmra.mrb[36].mxu0 %vm646_vm2, %v126_v37 }
  0xd7   :  { %3437 = vmatprep.mubr.msk.bf16.mxu0 %vm646_vm2, %v127_v38 }
  0xde   :  { %3438 = vmatmul.mubr.msk.bf16.gmra.mrb[40].mxu0 %vm646_vm2, %v128_v43 }
  0xdf   :  { %3441 = vmatprep.mubr.msk.bf16.mxu0 %vm646_vm2, %v129_v44 }
  0xe6   :  { %3442 = vmatmul.mubr.msk.bf16.gmra.mrb[44].mxu0 %vm646_vm2, %v130_v49  ;;  %v1830_v49 = vsel %vm1828_vm4, %v3682_v41, 0 }
  0xe7   :  { %3445 = vmatprep.mubr.msk.bf16.mxu0 %vm646_vm2, %v131_v51 }
  0xee   :  { %3446 = vmatmul.mubr.msk.bf16.gmra.mrb[48].mxu0 %vm646_vm2, %v132_v57 }
  0xef   :  { %3449 = vmatprep.mubr.msk.bf16.mxu0 %vm646_vm2, %v133_v58 }
  0xf6   :  { %3450 = vmatmul.mubr.msk.bf16.gmra.mrb[52].mxu0 %vm646_vm2, %v134_v63 }
  0xf7   :  { %3453 = vmatprep.mubr.msk.bf16.mxu0 %vm646_vm2, %v135_v0 }
  0xfe   :  { %3454 = vmatmul.mubr.msk.bf16.gmra.mrb[56].mxu0 %vm646_vm2, %v136_v5 }
  0xff   :  { %3457 = vmatprep.mubr.msk.bf16.mxu0 %vm646_vm2, %v137_v6 }
 0x106   :  { %3458 = vmatmul.mubr.msk.bf16.gmra.mrb[60].mxu0 %vm646_vm2, %v138_v9 }
 0x161   :  { %v3399_v16 = vpop.f32.mrb[0].mxu0 }
 0x162   :  { %v1038_v17 = vadd.f32 %v3399_v16, %v4452_v15  ;;  %v777_v18 = vpop.f32.mrb[1].mxu0 }
 0x163   :  { %v1036_v19 = vadd.f32 %v4452_v15, %v777_v18  ;;  %v3400_v20 = vpop.f32.mrb[2].mxu0 }
 0x164   :  { %v1039_v21 = vadd.f32 %v3400_v20, %v4452_v15  ;;  %v780_v22 = vpop.f32.mrb[3].mxu0  ;;  %v1102_v24 = vmax.f32 %v1038_v17, 0.0 }
 0x165   :  { %v1037_v23 = vadd.f32 %v4452_v15, %v780_v22  ;;  %v1100_v26 = vmax.f32 %v1036_v19, 0.0 }
 0x166   :  { %v1103_v25 = vmax.f32 %v1039_v21, 0.0 }
 0x167   :  { %v1101_v27 = vmax.f32 %v1037_v23, 0.0 }
 0x168   :  { %v1165_v28 = vpack.c.bf16 %v1103_v25, %v1102_v24 }
 0x169   :  { %v3403_v29 = vpop.f32.mrb[4].mxu0  ;;  %v1164_v30 = vpack.c.bf16 %v1101_v27, %v1100_v26 }
 0x16a   :  { %v1042_v31 = vadd.f32 %v3403_v29, %v4452_v15  ;;  %v793_v32 = vpop.f32.mrb[5].mxu0 }
 0x16b   :  { %v1040_v34 = vadd.f32 %v4452_v15, %v793_v32  ;;  %v3404_v35 = vpop.f32.mrb[6].mxu0  ;;  %3471 = vmatprep.mubr.msk.bf16.mxu1 %vm1230_vm3, %v1164_v30 }
 0x16c   :  { %v1043_v36 = vadd.f32 %v3404_v35, %v4452_v15  ;;  %v796_v37 = vpop.f32.mrb[7].mxu0  ;;  %3472 = vmatmul.mubr.msk.bf16.vlgmr.msra.gmra.mrb[0].mxu1 %vm1230_vm3, %v1165_v28  ;;  %v1106_v39 = vmax.f32 %v1042_v31, 0.0 }
 0x16d   :  { %v1041_v38 = vadd.f32 %v4452_v15, %v796_v37  ;;  %3536 = vmatpush3.bf16.msra.mxu1 %v3680_v10  ;;  %v1104_v42 = vmax.f32 %v1040_v34, 0.0 }
 0x16e   :  { %v1107_v40 = vmax.f32 %v1043_v36, 0.0  ;;  %3537 = vmatprep.subr.bf16.mxu1 %v3681_v33 }
 0x16f   :  { %v1105_v43 = vmax.f32 %v1041_v38, 0.0 }
 0x170   :  { %v1167_v44 = vpack.c.bf16 %v1107_v40, %v1106_v39 }
 0x171   :  { %v1166_v45 = vpack.c.bf16 %v1105_v43, %v1104_v42  ;;  %v3407_v46 = vpop.f32.mrb[8].mxu0  ;;  %3538 = vmatpush3.bf16.msra.mxu1 %v3681_v33 }
 0x172   :  { %v1046_v47 = vadd.f32 %v3407_v46, %v4452_v15  ;;  %v809_v48 = vpop.f32.mrb[9].mxu0  ;;  %3670 = vmatprep.subr.msk.bf16.mxu1 %vm1828_vm4, %v3682_v41 }
 0x173   :  { %v1044_v50 = vadd.f32 %v4452_v15, %v809_v48  ;;  %v3408_v51 = vpop.f32.mrb[10].mxu0  ;;  %3475 = vmatprep.mubr.msk.bf16.mxu1 %vm1230_vm3, %v1166_v45 }
 0x174   :  { %v1047_v52 = vadd.f32 %v3408_v51, %v4452_v15  ;;  %v812_v53 = vpop.f32.mrb[11].mxu0  ;;  %3476 = vmatmul.mubr.msk.bf16.gmra.mrb[4].mxu1 %vm1230_vm3, %v1167_v44  ;;  %v1110_v55 = vmax.f32 %v1046_v47, 0.0 }
 0x175   :  { %v1045_v54 = vadd.f32 %v4452_v15, %v812_v53  ;;  %3540 = vmatpush3.bf16.msra.mxu1 %v1830_v49  ;;  %v1108_v57 = vmax.f32 %v1044_v50, 0.0 }
 0x176   :  { %v1111_v56 = vmax.f32 %v1047_v52, 0.0 }
 0x177   :  { %v1109_v58 = vmax.f32 %v1045_v54, 0.0 }
 0x178   :  { %v1169_v59 = vpack.c.bf16 %v1111_v56, %v1110_v55 }
 0x179   :  { %v1168_v60 = vpack.c.bf16 %v1109_v58, %v1108_v57  ;;  %v3411_v61 = vpop.f32.mrb[12].mxu0 }
 0x17a   :  { %v1050_v62 = vadd.f32 %v3411_v61, %v4452_v15  ;;  %v825_v63 = vpop.f32.mrb[13].mxu0 }
 0x17b   :  { %v1048_v0 = vadd.f32 %v4452_v15, %v825_v63  ;;  %v3412_v1 = vpop.f32.mrb[14].mxu0  ;;  %3479 = vmatprep.mubr.msk.bf16.mxu1 %vm1230_vm3, %v1168_v60 }
 0x17c   :  { %v1051_v2 = vadd.f32 %v3412_v1, %v4452_v15  ;;  %v828_v3 = vpop.f32.mrb[15].mxu0  ;;  %3480 = vmatmul.mubr.msk.bf16.gmra.mrb[8].mxu1 %vm1230_vm3, %v1169_v59  ;;  %v1114_v5 = vmax.f32 %v1050_v62, 0.0 }
 0x17d   :  { %v1049_v4 = vadd.f32 %v4452_v15, %v828_v3  ;;  %v1112_v7 = vmax.f32 %v1048_v0, 0.0 }
 0x17e   :  { %v1115_v6 = vmax.f32 %v1051_v2, 0.0 }
 0x17f   :  { %v1113_v8 = vmax.f32 %v1049_v4, 0.0 }
 0x180   :  { %v1171_v9 = vpack.c.bf16 %v1115_v6, %v1114_v5 }
 0x181   :  { %v1170_v10 = vpack.c.bf16 %v1113_v8, %v1112_v7  ;;  %v3415_v11 = vpop.f32.mrb[16].mxu0 }
 0x182   :  { %v1054_v13 = vadd.f32 %v3415_v11, %v4452_v15  ;;  %v841_v16 = vpop.f32.mrb[17].mxu0 }
 0x183   :  { %v1052_v17 = vadd.f32 %v4452_v15, %v841_v16  ;;  %v3416_v18 = vpop.f32.mrb[18].mxu0  ;;  %3483 = vmatprep.mubr.msk.bf16.mxu1 %vm1230_vm3, %v1170_v10 }
 0x184   :  { %v1055_v19 = vadd.f32 %v3416_v18, %v4452_v15  ;;  %v844_v20 = vpop.f32.mrb[19].mxu0  ;;  %3484 = vmatmul.mubr.msk.bf16.gmra.mrb[12].mxu1 %vm1230_vm3, %v1171_v9  ;;  %v1118_v22 = vmax.f32 %v1054_v13, 0.0 }
 0x185   :  { %v1053_v21 = vadd.f32 %v4452_v15, %v844_v20  ;;  %v1116_v24 = vmax.f32 %v1052_v17, 0.0 }
 0x186   :  { %v1119_v23 = vmax.f32 %v1055_v19, 0.0 }
 0x187   :  { %v1117_v25 = vmax.f32 %v1053_v21, 0.0 }
 0x188   :  { %v1173_v26 = vpack.c.bf16 %v1119_v23, %v1118_v22 }
 0x189   :  { %v1172_v27 = vpack.c.bf16 %v1117_v25, %v1116_v24  ;;  %v3419_v28 = vpop.f32.mrb[20].mxu0 }
 0x18a   :  { %v1058_v29 = vadd.f32 %v3419_v28, %v4452_v15  ;;  %v857_v30 = vpop.f32.mrb[21].mxu0 }
 0x18b   :  { %v1056_v31 = vadd.f32 %v4452_v15, %v857_v30  ;;  %v3420_v32 = vpop.f32.mrb[22].mxu0  ;;  %3487 = vmatprep.mubr.msk.bf16.mxu1 %vm1230_vm3, %v1172_v27 }
 0x18c   :  { %v1059_v33 = vadd.f32 %v3420_v32, %v4452_v15  ;;  %v860_v34 = vpop.f32.mrb[23].mxu0  ;;  %3488 = vmatmul.mubr.msk.bf16.gmra.mrb[16].mxu1 %vm1230_vm3, %v1173_v26  ;;  %v1122_v36 = vmax.f32 %v1058_v29, 0.0 }
 0x18d   :  { %v1057_v35 = vadd.f32 %v4452_v15, %v860_v34  ;;  %v1120_v38 = vmax.f32 %v1056_v31, 0.0 }
 0x18e   :  { %v1123_v37 = vmax.f32 %v1059_v33, 0.0 }
 0x18f   :  { %v1121_v39 = vmax.f32 %v1057_v35, 0.0 }
 0x190   :  { %v1175_v40 = vpack.c.bf16 %v1123_v37, %v1122_v36 }
 0x191   :  { %v1174_v41 = vpack.c.bf16 %v1121_v39, %v1120_v38  ;;  %v3423_v42 = vpop.f32.mrb[24].mxu0 }
 0x192   :  { %v1062_v43 = vadd.f32 %v3423_v42, %v4452_v15  ;;  %v873_v44 = vpop.f32.mrb[25].mxu0 }
 0x193   :  { %v1060_v45 = vadd.f32 %v4452_v15, %v873_v44  ;;  %v3424_v46 = vpop.f32.mrb[26].mxu0  ;;  %3491 = vmatprep.mubr.msk.bf16.mxu1 %vm1230_vm3, %v1174_v41 }
 0x194   :  { %v1063_v47 = vadd.f32 %v3424_v46, %v4452_v15  ;;  %v876_v48 = vpop.f32.mrb[27].mxu0  ;;  %3492 = vmatmul.mubr.msk.bf16.gmra.mrb[20].mxu1 %vm1230_vm3, %v1175_v40  ;;  %v1126_v50 = vmax.f32 %v1062_v43, 0.0 }
 0x195   :  { %v1061_v49 = vadd.f32 %v4452_v15, %v876_v48  ;;  %v1124_v52 = vmax.f32 %v1060_v45, 0.0 }
 0x196   :  { %v1127_v51 = vmax.f32 %v1063_v47, 0.0 }
 0x197   :  { %v1125_v53 = vmax.f32 %v1061_v49, 0.0 }
 0x198   :  { %v1177_v54 = vpack.c.bf16 %v1127_v51, %v1126_v50 }
 0x199   :  { %v1176_v55 = vpack.c.bf16 %v1125_v53, %v1124_v52  ;;  %v3427_v56 = vpop.f32.mrb[28].mxu0 }
 0x19a   :  { %v1066_v57 = vadd.f32 %v3427_v56, %v4452_v15  ;;  %v889_v58 = vpop.f32.mrb[29].mxu0 }
 0x19b   :  { %v1064_v59 = vadd.f32 %v4452_v15, %v889_v58  ;;  %v3428_v60 = vpop.f32.mrb[30].mxu0  ;;  %3495 = vmatprep.mubr.msk.bf16.mxu1 %vm1230_vm3, %v1176_v55 }
 0x19c   :  { %v1067_v61 = vadd.f32 %v3428_v60, %v4452_v15  ;;  %v892_v62 = vpop.f32.mrb[31].mxu0  ;;  %3496 = vmatmul.mubr.msk.bf16.gmra.mrb[24].mxu1 %vm1230_vm3, %v1177_v54  ;;  %v1130_v0 = vmax.f32 %v1066_v57, 0.0 }
 0x19d   :  { %v1065_v63 = vadd.f32 %v4452_v15, %v892_v62  ;;  %v1128_v2 = vmax.f32 %v1064_v59, 0.0 }
 0x19e   :  { %v1131_v1 = vmax.f32 %v1067_v61, 0.0 }
 0x19f   :  { %v1129_v3 = vmax.f32 %v1065_v63, 0.0 }
 0x1a0   :  { %v1179_v4 = vpack.c.bf16 %v1131_v1, %v1130_v0 }
 0x1a1   :  { %v1178_v5 = vpack.c.bf16 %v1129_v3, %v1128_v2  ;;  %v3431_v6 = vpop.f32.mrb[32].mxu0 }
 0x1a2   :  { %v1070_v7 = vadd.f32 %v3431_v6, %v4452_v15  ;;  %v905_v8 = vpop.f32.mrb[33].mxu0 }
 0x1a3   :  { %v1068_v9 = vadd.f32 %v4452_v15, %v905_v8  ;;  %v3432_v10 = vpop.f32.mrb[34].mxu0  ;;  %3499 = vmatprep.mubr.msk.bf16.mxu1 %vm1230_vm3, %v1178_v5 }
 0x1a4   :  { %v1071_v11 = vadd.f32 %v3432_v10, %v4452_v15  ;;  %v908_v13 = vpop.f32.mrb[35].mxu0  ;;  %3500 = vmatmul.mubr.msk.bf16.gmra.mrb[28].mxu1 %vm1230_vm3, %v1179_v4  ;;  %v1134_v17 = vmax.f32 %v1070_v7, 0.0 }
 0x1a5   :  { %v1069_v16 = vadd.f32 %v4452_v15, %v908_v13  ;;  %v1132_v19 = vmax.f32 %v1068_v9, 0.0 }
 0x1a6   :  { %v1135_v18 = vmax.f32 %v1071_v11, 0.0 }
 0x1a7   :  { %v1133_v20 = vmax.f32 %v1069_v16, 0.0 }
 0x1a8   :  { %v1181_v21 = vpack.c.bf16 %v1135_v18, %v1134_v17 }
 0x1a9   :  { %v1180_v22 = vpack.c.bf16 %v1133_v20, %v1132_v19  ;;  %v3435_v23 = vpop.f32.mrb[36].mxu0 }
 0x1aa   :  { %v1074_v24 = vadd.f32 %v3435_v23, %v4452_v15  ;;  %v921_v25 = vpop.f32.mrb[37].mxu0 }
 0x1ab   :  { %v1072_v26 = vadd.f32 %v4452_v15, %v921_v25  ;;  %v3436_v27 = vpop.f32.mrb[38].mxu0  ;;  %3503 = vmatprep.mubr.msk.bf16.mxu1 %vm1230_vm3, %v1180_v22 }
 0x1ac   :  { %v1075_v28 = vadd.f32 %v3436_v27, %v4452_v15  ;;  %v924_v29 = vpop.f32.mrb[39].mxu0  ;;  %3504 = vmatmul.mubr.msk.bf16.gmra.mrb[32].mxu1 %vm1230_vm3, %v1181_v21  ;;  %v1138_v31 = vmax.f32 %v1074_v24, 0.0 }
 0x1ad   :  { %v1073_v30 = vadd.f32 %v4452_v15, %v924_v29  ;;  %v1136_v33 = vmax.f32 %v1072_v26, 0.0 }
 0x1ae   :  { %v1139_v32 = vmax.f32 %v1075_v28, 0.0 }
 0x1af   :  { %v1137_v34 = vmax.f32 %v1073_v30, 0.0 }
 0x1b0   :  { %v1183_v35 = vpack.c.bf16 %v1139_v32, %v1138_v31 }
 0x1b1   :  { %v1182_v36 = vpack.c.bf16 %v1137_v34, %v1136_v33  ;;  %v3439_v37 = vpop.f32.mrb[40].mxu0 }
 0x1b2   :  { %v1078_v38 = vadd.f32 %v3439_v37, %v4452_v15  ;;  %v937_v39 = vpop.f32.mrb[41].mxu0 }
 0x1b3   :  { %v1076_v40 = vadd.f32 %v4452_v15, %v937_v39  ;;  %v3440_v41 = vpop.f32.mrb[42].mxu0  ;;  %3507 = vmatprep.mubr.msk.bf16.mxu1 %vm1230_vm3, %v1182_v36 }
 0x1b4   :  { %v1079_v42 = vadd.f32 %v3440_v41, %v4452_v15  ;;  %v940_v43 = vpop.f32.mrb[43].mxu0  ;;  %3508 = vmatmul.mubr.msk.bf16.gmra.mrb[36].mxu1 %vm1230_vm3, %v1183_v35  ;;  %v1142_v45 = vmax.f32 %v1078_v38, 0.0 }
 0x1b5   :  { %v1077_v44 = vadd.f32 %v4452_v15, %v940_v43  ;;  %v1140_v47 = vmax.f32 %v1076_v40, 0.0 }
 0x1b6   :  { %v1143_v46 = vmax.f32 %v1079_v42, 0.0 }
 0x1b7   :  { %v1141_v48 = vmax.f32 %v1077_v44, 0.0 }
 0x1b8   :  { %v1185_v49 = vpack.c.bf16 %v1143_v46, %v1142_v45 }
 0x1b9   :  { %v1184_v50 = vpack.c.bf16 %v1141_v48, %v1140_v47  ;;  %v3443_v51 = vpop.f32.mrb[44].mxu0 }
 0x1ba   :  { %v1082_v52 = vadd.f32 %v3443_v51, %v4452_v15  ;;  %v953_v53 = vpop.f32.mrb[45].mxu0 }
 0x1bb   :  { %v1080_v54 = vadd.f32 %v4452_v15, %v953_v53  ;;  %v3444_v55 = vpop.f32.mrb[46].mxu0  ;;  %3511 = vmatprep.mubr.msk.bf16.mxu1 %vm1230_vm3, %v1184_v50 }
 0x1bc   :  { %v1083_v56 = vadd.f32 %v3444_v55, %v4452_v15  ;;  %v956_v57 = vpop.f32.mrb[47].mxu0  ;;  %3512 = vmatmul.mubr.msk.bf16.gmra.mrb[40].mxu1 %vm1230_vm3, %v1185_v49  ;;  %v1146_v59 = vmax.f32 %v1082_v52, 0.0 }
 0x1bd   :  { %v1081_v58 = vadd.f32 %v4452_v15, %v956_v57  ;;  %v1144_v61 = vmax.f32 %v1080_v54, 0.0 }
 0x1be   :  { %v1147_v60 = vmax.f32 %v1083_v56, 0.0 }
 0x1bf   :  { %v1145_v62 = vmax.f32 %v1081_v58, 0.0 }
 0x1c0   :  { %v1187_v63 = vpack.c.bf16 %v1147_v60, %v1146_v59  ;;  %v1198_v60 = vsub.s32 1, %v4443_v12 }
 0x1c1   :  { %v1186_v0 = vpack.c.bf16 %v1145_v62, %v1144_v61  ;;  %v3447_v1 = vpop.f32.mrb[48].mxu0 }
 0x1c2   :  { %v1086_v2 = vadd.f32 %v3447_v1, %v4452_v15  ;;  %v969_v3 = vpop.f32.mrb[49].mxu0  ;;  %v4558_v61 = vrot.slane %v4449_v14, %v1198_v60 }
 0x1c3   :  { %v1084_v4 = vadd.f32 %v4452_v15, %v969_v3  ;;  %v3448_v5 = vpop.f32.mrb[50].mxu0  ;;  %3515 = vmatprep.mubr.msk.bf16.mxu1 %vm1230_vm3, %v1186_v0 }
 0x1c4   :  { %v1087_v6 = vadd.f32 %v3448_v5, %v4452_v15  ;;  %v972_v7 = vpop.f32.mrb[51].mxu0  ;;  %3516 = vmatmul.mubr.msk.bf16.gmra.mrb[44].mxu1 %vm1230_vm3, %v1187_v63  ;;  %v1150_v9 = vmax.f32 %v1086_v2, 0.0 }
 0x1c5   :  { %v1085_v8 = vadd.f32 %v4452_v15, %v972_v7  ;;  %v1148_v11 = vmax.f32 %v1084_v4, 0.0 }
 0x1c6   :  { %v1151_v10 = vmax.f32 %v1087_v6, 0.0 }
 0x1c7   :  { %v1149_v13 = vmax.f32 %v1085_v8, 0.0 }
 0x1c8   :  { %v1189_v16 = vpack.c.bf16 %v1151_v10, %v1150_v9 }
 0x1c9   :  { %v1188_v17 = vpack.c.bf16 %v1149_v13, %v1148_v11  ;;  %v3451_v18 = vpop.f32.mrb[52].mxu0 }
 0x1ca   :  { %v1090_v19 = vadd.f32 %v3451_v18, %v4452_v15  ;;  %v985_v20 = vpop.f32.mrb[53].mxu0 }
 0x1cb   :  { %v1088_v21 = vadd.f32 %v4452_v15, %v985_v20  ;;  %v3452_v22 = vpop.f32.mrb[54].mxu0  ;;  %3519 = vmatprep.mubr.msk.bf16.mxu1 %vm1230_vm3, %v1188_v17 }
 0x1cc   :  { %v1091_v23 = vadd.f32 %v3452_v22, %v4452_v15  ;;  %v988_v24 = vpop.f32.mrb[55].mxu0  ;;  %3520 = vmatmul.mubr.msk.bf16.gmra.mrb[48].mxu1 %vm1230_vm3, %v1189_v16  ;;  %v1154_v26 = vmax.f32 %v1090_v19, 0.0 }
 0x1cd   :  { %v1089_v25 = vadd.f32 %v4452_v15, %v988_v24  ;;  %v1152_v28 = vmax.f32 %v1088_v21, 0.0 }
 0x1ce   :  { %v1155_v27 = vmax.f32 %v1091_v23, 0.0 }
 0x1cf   :  { %v1153_v29 = vmax.f32 %v1089_v25, 0.0 }
 0x1d0   :  { %v1191_v30 = vpack.c.bf16 %v1155_v27, %v1154_v26 }
 0x1d1   :  { %v1190_v31 = vpack.c.bf16 %v1153_v29, %v1152_v28  ;;  %v3455_v32 = vpop.f32.mrb[56].mxu0 }
 0x1d2   :  { %v1094_v33 = vadd.f32 %v3455_v32, %v4452_v15  ;;  %v1001_v34 = vpop.f32.mrb[57].mxu0 }
 0x1d3   :  { %v1092_v35 = vadd.f32 %v4452_v15, %v1001_v34  ;;  %v3456_v36 = vpop.f32.mrb[58].mxu0  ;;  %3523 = vmatprep.mubr.msk.bf16.mxu1 %vm1230_vm3, %v1190_v31 }
 0x1d4   :  { %v1095_v37 = vadd.f32 %v3456_v36, %v4452_v15  ;;  %v1004_v38 = vpop.f32.mrb[59].mxu0  ;;  %3524 = vmatmul.mubr.msk.bf16.gmra.mrb[52].mxu1 %vm1230_vm3, %v1191_v30  ;;  %v1158_v40 = vmax.f32 %v1094_v33, 0.0 }
 0x1d5   :  { %v1093_v39 = vadd.f32 %v4452_v15, %v1004_v38  ;;  %v1156_v42 = vmax.f32 %v1092_v35, 0.0 }
 0x1d6   :  { %v1159_v41 = vmax.f32 %v1095_v37, 0.0 }
 0x1d7   :  { %v1157_v43 = vmax.f32 %v1093_v39, 0.0 }
 0x1d8   :  { %v1193_v44 = vpack.c.bf16 %v1159_v41, %v1158_v40 }
 0x1d9   :  { %v1192_v45 = vpack.c.bf16 %v1157_v43, %v1156_v42  ;;  %v3459_v46 = vpop.f32.mrb[60].mxu0 }
 0x1da   :  { %v1098_v47 = vadd.f32 %v3459_v46, %v4452_v15  ;;  %v1017_v48 = vpop.f32.mrb[61].mxu0 }
 0x1db   :  { %v1096_v49 = vadd.f32 %v4452_v15, %v1017_v48  ;;  %v3460_v50 = vpop.f32.mrb[62].mxu0  ;;  %3527 = vmatprep.mubr.msk.bf16.mxu1 %vm1230_vm3, %v1192_v45 }
 0x1dc   :  { %v1099_v51 = vadd.f32 %v3460_v50, %v4452_v15  ;;  %v1020_v52 = vpop.f32.mrb[63].mxu0  ;;  %3528 = vmatmul.mubr.msk.bf16.gmra.mrb[56].mxu1 %vm1230_vm3, %v1193_v44  ;;  %v1162_v54 = vmax.f32 %v1098_v47, 0.0 }
 0x1dd   :  { %v1097_v53 = vadd.f32 %v4452_v15, %v1020_v52  ;;  %v1160_v56 = vmax.f32 %v1096_v49, 0.0 }
 0x1de   :  { %v1163_v55 = vmax.f32 %v1099_v51, 0.0 }
 0x1df   :  { %v1161_v57 = vmax.f32 %v1097_v53, 0.0 }
 0x1e0   :  { %v1195_v58 = vpack.c.bf16 %v1163_v55, %v1162_v54 }
 0x1e1   :  { %v1194_v59 = vpack.c.bf16 %v1161_v57, %v1160_v56 }
 0x1e3   :  { %3531 = vmatprep.mubr.msk.bf16.mxu1 %vm1230_vm3, %v1194_v59 }
 0x1e4   :  { %3532 = vmatmul.mubr.msk.bf16.gmra.mrb[60].mxu1 %vm1230_vm3, %v1195_v58 }
 0x23f   :  { %v3473_v62 = vpop.f32.mrb[0].mxu1 }
 0x240   :  { %v1370_v63 = vadd.f32 %v3473_v62, %v4558_v61  ;;  %v1361_v0 = vpop.f32.mrb[1].mxu1 }
 0x241   :  { %v1362_v15 = vadd.f32 %v1361_v0, %v4558_v61  ;;  %v3474_v1 = vpop.f32.mrb[2].mxu1 }
 0x242   :  { %v1373_v2 = vadd.f32 %v3474_v1, %v4558_v61  ;;  %v1364_v3 = vpop.f32.mrb[3].mxu1  ;;  %v1618_v5 = vmax.f32 %v1370_v63, 0.0 }
 0x243   :  { %v1365_v4 = vadd.f32 %v1364_v3, %v4558_v61  ;;  %v1616_v7 = vmax.f32 %v1362_v15, 0.0 }
 0x244   :  { %v1619_v6 = vmax.f32 %v1373_v2, 0.0 }
 0x245   :  { %v1617_v8 = vmax.f32 %v1365_v4, 0.0 }
 0x246   :  { %v1681_v9 = vpack.c.bf16 %v1619_v6, %v1618_v5 }
 0x247   :  { %v1680_v14 = vpack.c.bf16 %v1617_v8, %v1616_v7  ;;  %v3477_v10 = vpop.f32.mrb[4].mxu1 }
 0x248   :  { %v1386_v11 = vadd.f32 %v3477_v10, %v4558_v61  ;;  %v1377_v13 = vpop.f32.mrb[5].mxu1 }
 0x249   :  { %v1378_v16 = vadd.f32 %v1377_v13, %v4558_v61  ;;  %v3478_v17 = vpop.f32.mrb[6].mxu1  ;;  %3541 = vmatprep.mubr.msk.bf16.mxu1 %vm1731_vm5, %v1680_v14 }
 0x24a   :  { %v1389_v18 = vadd.f32 %v3478_v17, %v4558_v61  ;;  %v1380_v19 = vpop.f32.mrb[7].mxu1  ;;  %3542 = vmatmul.mubr.msk.bf16.vlgmr.msra.gmra.mrb[64].mxu1 %vm1731_vm5, %v1681_v9  ;;  %v1622_v21 = vmax.f32 %v1386_v11, 0.0 }
 0x24b   :  { %v1381_v20 = vadd.f32 %v1380_v19, %v4558_v61  ;;  %v1620_v23 = vmax.f32 %v1378_v16, 0.0 }
 0x24c   :  { %v1623_v22 = vmax.f32 %v1389_v18, 0.0 }
 0x24d   :  { %v1621_v24 = vmax.f32 %v1381_v20, 0.0 }
 0x24e   :  { %v1683_v25 = vpack.c.bf16 %v1623_v22, %v1622_v21 }
 0x24f   :  { %v1682_v26 = vpack.c.bf16 %v1621_v24, %v1620_v23  ;;  %v3481_v27 = vpop.f32.mrb[8].mxu1 }
 0x250   :  { %v1402_v28 = vadd.f32 %v3481_v27, %v4558_v61  ;;  %v1393_v29 = vpop.f32.mrb[9].mxu1 }
 0x251   :  { %v1394_v30 = vadd.f32 %v1393_v29, %v4558_v61  ;;  %v3482_v31 = vpop.f32.mrb[10].mxu1  ;;  %3545 = vmatprep.mubr.msk.bf16.mxu1 %vm1731_vm5, %v1682_v26 }
 0x252   :  { %v1405_v32 = vadd.f32 %v3482_v31, %v4558_v61  ;;  %v1396_v33 = vpop.f32.mrb[11].mxu1  ;;  %3546 = vmatmul.mubr.msk.bf16.gmra.mrb[68].mxu1 %vm1731_vm5, %v1683_v25  ;;  %v1626_v35 = vmax.f32 %v1402_v28, 0.0 }
 0x253   :  { %v1397_v34 = vadd.f32 %v1396_v33, %v4558_v61  ;;  %v1624_v37 = vmax.f32 %v1394_v30, 0.0 }
 0x254   :  { %v1627_v36 = vmax.f32 %v1405_v32, 0.0 }
 0x255   :  { %v1625_v38 = vmax.f32 %v1397_v34, 0.0 }
 0x256   :  { %v1685_v39 = vpack.c.bf16 %v1627_v36, %v1626_v35 }
 0x257   :  { %v1684_v40 = vpack.c.bf16 %v1625_v38, %v1624_v37  ;;  %v3485_v41 = vpop.f32.mrb[12].mxu1 }
 0x258   :  { %v1418_v42 = vadd.f32 %v3485_v41, %v4558_v61  ;;  %v1409_v43 = vpop.f32.mrb[13].mxu1 }
 0x259   :  { %v1410_v44 = vadd.f32 %v1409_v43, %v4558_v61  ;;  %v3486_v45 = vpop.f32.mrb[14].mxu1  ;;  %3549 = vmatprep.mubr.msk.bf16.mxu1 %vm1731_vm5, %v1684_v40 }
 0x25a   :  { %v1421_v46 = vadd.f32 %v3486_v45, %v4558_v61  ;;  %v1412_v47 = vpop.f32.mrb[15].mxu1  ;;  %3550 = vmatmul.mubr.msk.bf16.gmra.mrb[72].mxu1 %vm1731_vm5, %v1685_v39  ;;  %v1630_v49 = vmax.f32 %v1418_v42, 0.0 }
 0x25b   :  { %v1413_v48 = vadd.f32 %v1412_v47, %v4558_v61  ;;  %v1628_v51 = vmax.f32 %v1410_v44, 0.0 }
 0x25c   :  { %v1631_v50 = vmax.f32 %v1421_v46, 0.0 }
 0x25d   :  { %v1629_v52 = vmax.f32 %v1413_v48, 0.0 }
 0x25e   :  { %v1687_v53 = vpack.c.bf16 %v1631_v50, %v1630_v49 }
 0x25f   :  { %v1686_v54 = vpack.c.bf16 %v1629_v52, %v1628_v51  ;;  %v3489_v55 = vpop.f32.mrb[16].mxu1 }
 0x260   :  { %v1434_v56 = vadd.f32 %v3489_v55, %v4558_v61  ;;  %v1425_v57 = vpop.f32.mrb[17].mxu1 }
 0x261   :  { %v1426_v58 = vadd.f32 %v1425_v57, %v4558_v61  ;;  %v3490_v59 = vpop.f32.mrb[18].mxu1  ;;  %3553 = vmatprep.mubr.msk.bf16.mxu1 %vm1731_vm5, %v1686_v54 }
 0x262   :  { %v1437_v60 = vadd.f32 %v3490_v59, %v4558_v61  ;;  %v1428_v62 = vpop.f32.mrb[19].mxu1  ;;  %3554 = vmatmul.mubr.msk.bf16.gmra.mrb[76].mxu1 %vm1731_vm5, %v1687_v53  ;;  %v1634_v0 = vmax.f32 %v1434_v56, 0.0 }
 0x263   :  { %v1429_v63 = vadd.f32 %v1428_v62, %v4558_v61  ;;  %v1632_v1 = vmax.f32 %v1426_v58, 0.0 }
 0x264   :  { %v1635_v15 = vmax.f32 %v1437_v60, 0.0 }
 0x265   :  { %v1633_v2 = vmax.f32 %v1429_v63, 0.0 }
 0x266   :  { %v1689_v3 = vpack.c.bf16 %v1635_v15, %v1634_v0 }
 0x267   :  { %v1688_v4 = vpack.c.bf16 %v1633_v2, %v1632_v1  ;;  %v3493_v5 = vpop.f32.mrb[20].mxu1 }
 0x268   :  { %v1450_v6 = vadd.f32 %v3493_v5, %v4558_v61  ;;  %v1441_v7 = vpop.f32.mrb[21].mxu1 }
 0x269   :  { %v1442_v8 = vadd.f32 %v1441_v7, %v4558_v61  ;;  %v3494_v9 = vpop.f32.mrb[22].mxu1  ;;  %3557 = vmatprep.mubr.msk.bf16.mxu1 %vm1731_vm5, %v1688_v4 }
 0x26a   :  { %v1453_v14 = vadd.f32 %v3494_v9, %v4558_v61  ;;  %v1444_v10 = vpop.f32.mrb[23].mxu1  ;;  %3558 = vmatmul.mubr.msk.bf16.gmra.mrb[80].mxu1 %vm1731_vm5, %v1689_v3  ;;  %v1638_v13 = vmax.f32 %v1450_v6, 0.0 }
 0x26b   :  { %v1445_v11 = vadd.f32 %v1444_v10, %v4558_v61  ;;  %v1636_v17 = vmax.f32 %v1442_v8, 0.0 }
 0x26c   :  { %v1639_v16 = vmax.f32 %v1453_v14, 0.0 }
 0x26d   :  { %v1637_v18 = vmax.f32 %v1445_v11, 0.0 }
 0x26e   :  { %v1691_v19 = vpack.c.bf16 %v1639_v16, %v1638_v13 }
 0x26f   :  { %v1690_v20 = vpack.c.bf16 %v1637_v18, %v1636_v17  ;;  %v3497_v21 = vpop.f32.mrb[24].mxu1 }
 0x270   :  { %v1466_v22 = vadd.f32 %v3497_v21, %v4558_v61  ;;  %v1457_v23 = vpop.f32.mrb[25].mxu1 }
 0x271   :  { %v1458_v24 = vadd.f32 %v1457_v23, %v4558_v61  ;;  %v3498_v25 = vpop.f32.mrb[26].mxu1  ;;  %3561 = vmatprep.mubr.msk.bf16.mxu1 %vm1731_vm5, %v1690_v20 }
 0x272   :  { %v1469_v26 = vadd.f32 %v3498_v25, %v4558_v61  ;;  %v1460_v27 = vpop.f32.mrb[27].mxu1  ;;  %3562 = vmatmul.mubr.msk.bf16.gmra.mrb[84].mxu1 %vm1731_vm5, %v1691_v19  ;;  %v1642_v29 = vmax.f32 %v1466_v22, 0.0 }
 0x273   :  { %v1461_v28 = vadd.f32 %v1460_v27, %v4558_v61  ;;  %v1640_v31 = vmax.f32 %v1458_v24, 0.0 }
 0x274   :  { %v1643_v30 = vmax.f32 %v1469_v26, 0.0 }
 0x275   :  { %v1641_v32 = vmax.f32 %v1461_v28, 0.0 }
 0x276   :  { %v1693_v33 = vpack.c.bf16 %v1643_v30, %v1642_v29 }
 0x277   :  { %v1692_v34 = vpack.c.bf16 %v1641_v32, %v1640_v31  ;;  %v3501_v35 = vpop.f32.mrb[28].mxu1 }
 0x278   :  { %v1482_v36 = vadd.f32 %v3501_v35, %v4558_v61  ;;  %v1473_v37 = vpop.f32.mrb[29].mxu1 }
 0x279   :  { %v1474_v38 = vadd.f32 %v1473_v37, %v4558_v61  ;;  %v3502_v39 = vpop.f32.mrb[30].mxu1  ;;  %3565 = vmatprep.mubr.msk.bf16.mxu1 %vm1731_vm5, %v1692_v34 }
 0x27a   :  { %v1485_v40 = vadd.f32 %v3502_v39, %v4558_v61  ;;  %v1476_v41 = vpop.f32.mrb[31].mxu1  ;;  %3566 = vmatmul.mubr.msk.bf16.gmra.mrb[88].mxu1 %vm1731_vm5, %v1693_v33  ;;  %v1646_v43 = vmax.f32 %v1482_v36, 0.0 }
 0x27b   :  { %v1477_v42 = vadd.f32 %v1476_v41, %v4558_v61  ;;  %v1644_v45 = vmax.f32 %v1474_v38, 0.0 }
 0x27c   :  { %v1647_v44 = vmax.f32 %v1485_v40, 0.0 }
 0x27d   :  { %v1645_v46 = vmax.f32 %v1477_v42, 0.0 }
 0x27e   :  { %v1695_v47 = vpack.c.bf16 %v1647_v44, %v1646_v43 }
 0x27f   :  { %v1694_v48 = vpack.c.bf16 %v1645_v46, %v1644_v45  ;;  %v3505_v49 = vpop.f32.mrb[32].mxu1 }
 0x280   :  { %v1498_v50 = vadd.f32 %v3505_v49, %v4558_v61  ;;  %v1489_v51 = vpop.f32.mrb[33].mxu1 }
 0x281   :  { %v1490_v52 = vadd.f32 %v1489_v51, %v4558_v61  ;;  %v3506_v53 = vpop.f32.mrb[34].mxu1  ;;  %3569 = vmatprep.mubr.msk.bf16.mxu1 %vm1731_vm5, %v1694_v48 }
 0x282   :  { %v1501_v54 = vadd.f32 %v3506_v53, %v4558_v61  ;;  %v1492_v55 = vpop.f32.mrb[35].mxu1  ;;  %3570 = vmatmul.mubr.msk.bf16.gmra.mrb[92].mxu1 %vm1731_vm5, %v1695_v47  ;;  %v1650_v57 = vmax.f32 %v1498_v50, 0.0 }
 0x283   :  { %v1493_v56 = vadd.f32 %v1492_v55, %v4558_v61  ;;  %v1648_v59 = vmax.f32 %v1490_v52, 0.0 }
 0x284   :  { %v1651_v58 = vmax.f32 %v1501_v54, 0.0 }
 0x285   :  { %v1649_v60 = vmax.f32 %v1493_v56, 0.0 }
 0x286   :  { %v1697_v62 = vpack.c.bf16 %v1651_v58, %v1650_v57 }
 0x287   :  { %v1696_v63 = vpack.c.bf16 %v1649_v60, %v1648_v59  ;;  %v3509_v0 = vpop.f32.mrb[36].mxu1 }
 0x288   :  { %v1514_v15 = vadd.f32 %v3509_v0, %v4558_v61  ;;  %v1505_v1 = vpop.f32.mrb[37].mxu1 }
 0x289   :  { %v1506_v2 = vadd.f32 %v1505_v1, %v4558_v61  ;;  %v3510_v3 = vpop.f32.mrb[38].mxu1  ;;  %3573 = vmatprep.mubr.msk.bf16.mxu1 %vm1731_vm5, %v1696_v63 }
 0x28a   :  { %v1517_v4 = vadd.f32 %v3510_v3, %v4558_v61  ;;  %v1508_v5 = vpop.f32.mrb[39].mxu1  ;;  %3574 = vmatmul.mubr.msk.bf16.gmra.mrb[96].mxu1 %vm1731_vm5, %v1697_v62  ;;  %v1654_v7 = vmax.f32 %v1514_v15, 0.0 }
 0x28b   :  { %v1509_v6 = vadd.f32 %v1508_v5, %v4558_v61  ;;  %v1652_v9 = vmax.f32 %v1506_v2, 0.0 }
 0x28c   :  { %v1655_v8 = vmax.f32 %v1517_v4, 0.0 }
 0x28d   :  { %v1653_v14 = vmax.f32 %v1509_v6, 0.0 }
 0x28e   :  { %v1699_v10 = vpack.c.bf16 %v1655_v8, %v1654_v7 }
 0x28f   :  { %v1698_v11 = vpack.c.bf16 %v1653_v14, %v1652_v9  ;;  %v3513_v13 = vpop.f32.mrb[40].mxu1 }
 0x290   :  { %v1530_v16 = vadd.f32 %v3513_v13, %v4558_v61  ;;  %v1521_v17 = vpop.f32.mrb[41].mxu1 }
 0x291   :  { %v1522_v18 = vadd.f32 %v1521_v17, %v4558_v61  ;;  %v3514_v19 = vpop.f32.mrb[42].mxu1  ;;  %3577 = vmatprep.mubr.msk.bf16.mxu1 %vm1731_vm5, %v1698_v11 }
 0x292   :  { %v1533_v20 = vadd.f32 %v3514_v19, %v4558_v61  ;;  %v1524_v21 = vpop.f32.mrb[43].mxu1  ;;  %3578 = vmatmul.mubr.msk.bf16.gmra.mrb[100].mxu1 %vm1731_vm5, %v1699_v10  ;;  %v1658_v23 = vmax.f32 %v1530_v16, 0.0 }
 0x293   :  { %v1525_v22 = vadd.f32 %v1524_v21, %v4558_v61  ;;  %v1656_v25 = vmax.f32 %v1522_v18, 0.0 }
 0x294   :  { %v1659_v24 = vmax.f32 %v1533_v20, 0.0 }
 0x295   :  { %v1657_v26 = vmax.f32 %v1525_v22, 0.0 }
 0x296   :  { %v1701_v27 = vpack.c.bf16 %v1659_v24, %v1658_v23 }
 0x297   :  { %v1700_v28 = vpack.c.bf16 %v1657_v26, %v1656_v25  ;;  %v3517_v29 = vpop.f32.mrb[44].mxu1 }
 0x298   :  { %v1546_v30 = vadd.f32 %v3517_v29, %v4558_v61  ;;  %v1537_v31 = vpop.f32.mrb[45].mxu1 }
 0x299   :  { %v1538_v32 = vadd.f32 %v1537_v31, %v4558_v61  ;;  %v3518_v33 = vpop.f32.mrb[46].mxu1  ;;  %3581 = vmatprep.mubr.msk.bf16.mxu1 %vm1731_vm5, %v1700_v28 }
 0x29a   :  { %v1549_v34 = vadd.f32 %v3518_v33, %v4558_v61  ;;  %v1540_v35 = vpop.f32.mrb[47].mxu1  ;;  %3582 = vmatmul.mubr.msk.bf16.gmra.mrb[104].mxu1 %vm1731_vm5, %v1701_v27  ;;  %v1662_v37 = vmax.f32 %v1546_v30, 0.0 }
 0x29b   :  { %v1541_v36 = vadd.f32 %v1540_v35, %v4558_v61  ;;  %v1660_v39 = vmax.f32 %v1538_v32, 0.0 }
 0x29c   :  { %v1663_v38 = vmax.f32 %v1549_v34, 0.0 }
 0x29d   :  { %v1661_v40 = vmax.f32 %v1541_v36, 0.0 }
 0x29e   :  { %v1703_v41 = vpack.c.bf16 %v1663_v38, %v1662_v37  ;;  %v1714_v37 = vsub.s32 2, %v4443_v12  ;;  %v4660_v38 = vld [vmem:[%s5188_s3] sm:$0xff] }
 0x29f   :  { %v1702_v42 = vpack.c.bf16 %v1661_v40, %v1660_v39  ;;  %v3521_v43 = vpop.f32.mrb[48].mxu1 }
 0x2a0   :  { %v1562_v44 = vadd.f32 %v3521_v43, %v4558_v61  ;;  %v1553_v45 = vpop.f32.mrb[49].mxu1  ;;  %v4663_v39 = vrot.slane %v4660_v38, %v1714_v37 }
 0x2a1   :  { %v1554_v46 = vadd.f32 %v1553_v45, %v4558_v61  ;;  %v3522_v47 = vpop.f32.mrb[50].mxu1  ;;  %3585 = vmatprep.mubr.msk.bf16.mxu1 %vm1731_vm5, %v1702_v42 }
 0x2a2   :  { %v1565_v48 = vadd.f32 %v3522_v47, %v4558_v61  ;;  %v1556_v49 = vpop.f32.mrb[51].mxu1  ;;  %3586 = vmatmul.mubr.msk.bf16.gmra.mrb[108].mxu1 %vm1731_vm5, %v1703_v41  ;;  %v1666_v51 = vmax.f32 %v1562_v44, 0.0 }
 0x2a3   :  { %v1557_v50 = vadd.f32 %v1556_v49, %v4558_v61  ;;  %v1664_v53 = vmax.f32 %v1554_v46, 0.0 }
 0x2a4   :  { %v1667_v52 = vmax.f32 %v1565_v48, 0.0 }
 0x2a5   :  { %v1665_v54 = vmax.f32 %v1557_v50, 0.0 }
 0x2a6   :  { %v1705_v55 = vpack.c.bf16 %v1667_v52, %v1666_v51 }
 0x2a7   :  { %v1704_v56 = vpack.c.bf16 %v1665_v54, %v1664_v53  ;;  %v3525_v57 = vpop.f32.mrb[52].mxu1 }
 0x2a8   :  { %v1578_v58 = vadd.f32 %v3525_v57, %v4558_v61  ;;  %v1569_v59 = vpop.f32.mrb[53].mxu1 }
 0x2a9   :  { %v1570_v60 = vadd.f32 %v1569_v59, %v4558_v61  ;;  %v3526_v62 = vpop.f32.mrb[54].mxu1  ;;  %3589 = vmatprep.mubr.msk.bf16.mxu1 %vm1731_vm5, %v1704_v56 }
 0x2aa   :  { %v1581_v63 = vadd.f32 %v3526_v62, %v4558_v61  ;;  %v1572_v0 = vpop.f32.mrb[55].mxu1  ;;  %3590 = vmatmul.mubr.msk.bf16.gmra.mrb[112].mxu1 %vm1731_vm5, %v1705_v55  ;;  %v1670_v1 = vmax.f32 %v1578_v58, 0.0 }
 0x2ab   :  { %v1573_v15 = vadd.f32 %v1572_v0, %v4558_v61  ;;  %v1668_v3 = vmax.f32 %v1570_v60, 0.0 }
 0x2ac   :  { %v1671_v2 = vmax.f32 %v1581_v63, 0.0 }
 0x2ad   :  { %v1669_v4 = vmax.f32 %v1573_v15, 0.0 }
 0x2ae   :  { %v1707_v5 = vpack.c.bf16 %v1671_v2, %v1670_v1 }
 0x2af   :  { %v1706_v6 = vpack.c.bf16 %v1669_v4, %v1668_v3  ;;  %v3529_v7 = vpop.f32.mrb[56].mxu1 }
 0x2b0   :  { %v1594_v8 = vadd.f32 %v3529_v7, %v4558_v61  ;;  %v1585_v9 = vpop.f32.mrb[57].mxu1 }
 0x2b1   :  { %v1586_v14 = vadd.f32 %v1585_v9, %v4558_v61  ;;  %v3530_v10 = vpop.f32.mrb[58].mxu1  ;;  %3593 = vmatprep.mubr.msk.bf16.mxu1 %vm1731_vm5, %v1706_v6 }
 0x2b2   :  { %v1597_v11 = vadd.f32 %v3530_v10, %v4558_v61  ;;  %v1588_v13 = vpop.f32.mrb[59].mxu1  ;;  %3594 = vmatmul.mubr.msk.bf16.gmra.mrb[116].mxu1 %vm1731_vm5, %v1707_v5  ;;  %v1674_v17 = vmax.f32 %v1594_v8, 0.0 }
 0x2b3   :  { %v1589_v16 = vadd.f32 %v1588_v13, %v4558_v61  ;;  %v1672_v19 = vmax.f32 %v1586_v14, 0.0 }
 0x2b4   :  { %v1675_v18 = vmax.f32 %v1597_v11, 0.0 }
 0x2b5   :  { %v1673_v20 = vmax.f32 %v1589_v16, 0.0 }
 0x2b6   :  { %v1709_v21 = vpack.c.bf16 %v1675_v18, %v1674_v17 }
 0x2b7   :  { %v1708_v22 = vpack.c.bf16 %v1673_v20, %v1672_v19  ;;  %v3533_v23 = vpop.f32.mrb[60].mxu1 }
 0x2b8   :  { %v1610_v24 = vadd.f32 %v3533_v23, %v4558_v61  ;;  %v1601_v25 = vpop.f32.mrb[61].mxu1 }
 0x2b9   :  { %v1602_v26 = vadd.f32 %v1601_v25, %v4558_v61  ;;  %v3534_v27 = vpop.f32.mrb[62].mxu1  ;;  %3597 = vmatprep.mubr.msk.bf16.mxu1 %vm1731_vm5, %v1708_v22 }
 0x2ba   :  { %v1613_v28 = vadd.f32 %v3534_v27, %v4558_v61  ;;  %v1604_v29 = vpop.f32.mrb[63].mxu1  ;;  %3598 = vmatmul.mubr.msk.bf16.gmra.mrb[120].mxu1 %vm1731_vm5, %v1709_v21  ;;  %v1678_v31 = vmax.f32 %v1610_v24, 0.0 }
 0x2bb   :  { %v1605_v30 = vadd.f32 %v1604_v29, %v4558_v61  ;;  %v1676_v33 = vmax.f32 %v1602_v26, 0.0  ;;  %v2187_v61 = vsub.s32 3, %v4443_v12 }
 0x2bc   :  { %v1679_v32 = vmax.f32 %v1613_v28, 0.0 }
 0x2bd   :  { %v1677_v34 = vmax.f32 %v1605_v30, 0.0  ;;  %v4668_v43 = vrot.slane %v4660_v38, %v2187_v61 }
 0x2be   :  { %v1711_v35 = vpack.c.bf16 %v1679_v32, %v1678_v31 }
 0x2bf   :  { %v1710_v36 = vpack.c.bf16 %v1677_v34, %v1676_v33 }
 0x2c1   :  { %3601 = vmatprep.mubr.msk.bf16.mxu1 %vm1731_vm5, %v1710_v36 }
 0x2c2   :  { %3602 = vmatmul.mubr.msk.bf16.gmra.mrb[124].mxu1 %vm1731_vm5, %v1711_v35 }
 0x31d   :  { %v3543_v40 = vpop.f32.mrb[64].mxu1 }
 0x31e   :  { %v1875_v41 = vadd.f32 %v3543_v40, %v4663_v39  ;;  %v1866_v42 = vpop.f32.mrb[65].mxu1 }
 0x31f   :  { %v1867_v44 = vadd.f32 %v1866_v42, %v4663_v39  ;;  %v3544_v45 = vpop.f32.mrb[66].mxu1 }
 0x320   :  { %v2123_v46 = vmax.f32 %v1875_v41, 0.0  ;;  %v1878_v47 = vadd.f32 %v3544_v45, %v4663_v39  ;;  %v1869_v48 = vpop.f32.mrb[67].mxu1 }
 0x321   :  { %v2121_v49 = vmax.f32 %v1867_v44, 0.0  ;;  %v1870_v50 = vadd.f32 %v1869_v48, %v4663_v39 }
 0x322   :  { %v2124_v51 = vmax.f32 %v1878_v47, 0.0  ;;  %v2191_v52 = vmul.f32 %v4668_v43, %v2123_v46 }
 0x323   :  { %v2122_v53 = vmax.f32 %v1870_v50, 0.0  ;;  %v2189_v54 = vmul.f32 %v4668_v43, %v2121_v49 }
 0x324   :  { %v2259_v55 = vsel %vm646_vm2, %v2191_v52, 0.0  ;;  %v2192_v56 = vmul.f32 %v4668_v43, %v2124_v51 }
 0x325   :  { %2260 = vadd.xlane.f32.xlu1 %v2259_v55  ;;  %v3547_v57 = vpop.f32.mrb[68].mxu1  ;;  %v2253_v58 = vsel %vm646_vm2, %v2189_v54, 0.0  ;;  %v2190_v59 = vmul.f32 %v4668_v43, %v2122_v53 }
 0x326   :  { %v1891_v60 = vadd.f32 %v3547_v57, %v4663_v39  ;;  %v1882_v62 = vpop.f32.mrb[69].mxu1  ;;  %2254 = vadd.xlane.f32.xlu0 %v2253_v58  ;;  %v2262_v3 = vsel %vm646_vm2, %v2192_v56, 0.0 }
 0x327   :  { %v1883_v63 = vadd.f32 %v1882_v62, %v4663_v39  ;;  %v3548_v0 = vpop.f32.mrb[70].mxu1  ;;  %v2256_v6 = vsel %vm646_vm2, %v2190_v59, 0.0 }
 0x328   :  { %v2127_v15 = vmax.f32 %v1891_v60, 0.0  ;;  %v1894_v1 = vadd.f32 %v3548_v0, %v4663_v39  ;;  %v1885_v2 = vpop.f32.mrb[71].mxu1 }
 0x329   :  { %v2125_v4 = vmax.f32 %v1883_v63, 0.0  ;;  %v1886_v5 = vadd.f32 %v1885_v2, %v4663_v39  ;;  %2263 = vadd.xlane.f32.xlu1 %v2262_v3 }
 0x32a   :  { %v2128_v7 = vmax.f32 %v1894_v1, 0.0  ;;  %2257 = vadd.xlane.f32.xlu0 %v2256_v6  ;;  %v2195_v8 = vmul.f32 %v4668_v43, %v2127_v15 }
 0x32b   :  { %v2126_v9 = vmax.f32 %v1886_v5, 0.0  ;;  %v2193_v13 = vmul.f32 %v4668_v43, %v2125_v4 }
 0x32c   :  { %v2271_v14 = vsel %vm646_vm2, %v2195_v8, 0.0  ;;  %v2196_v10 = vmul.f32 %v4668_v43, %v2128_v7 }
 0x32d   :  { %v3551_v11 = vpop.f32.mrb[72].mxu1  ;;  %v2194_v19 = vmul.f32 %v4668_v43, %v2126_v9  ;;  %v2265_v27 = vsel %vm646_vm2, %v2193_v13, 0.0 }
 0x32e   :  { %v1907_v16 = vadd.f32 %v3551_v11, %v4663_v39  ;;  %v1898_v17 = vpop.f32.mrb[73].mxu1  ;;  %2272 = vadd.xlane.f32.xlu0 %v2271_v14  ;;  %v2274_v18 = vsel %vm646_vm2, %v2196_v10, 0.0 }
 0x32f   :  { %v1899_v20 = vadd.f32 %v1898_v17, %v4663_v39  ;;  %2275 = vadd.xlane.f32.xlu1 %v2274_v18  ;;  %v3552_v21 = vpop.f32.mrb[74].mxu1  ;;  %v2268_v29 = vsel %vm646_vm2, %v2194_v19, 0.0 }
 0x330   :  { %v2131_v22 = vmax.f32 %v1907_v16, 0.0  ;;  %v1910_v23 = vadd.f32 %v3552_v21, %v4663_v39  ;;  %v1901_v24 = vpop.f32.mrb[75].mxu1 }
 0x331   :  { %v2129_v25 = vmax.f32 %v1899_v20, 0.0  ;;  %v1902_v26 = vadd.f32 %v1901_v24, %v4663_v39 }
 0x332   :  { %v2132_v28 = vmax.f32 %v1910_v23, 0.0  ;;  %2266 = vadd.xlane.f32.xlu0 %v2265_v27  ;;  %v2199_v30 = vmul.f32 %v4668_v43, %v2131_v22 }
 0x333   :  { %v2130_v31 = vmax.f32 %v1902_v26, 0.0  ;;  %2269 = vadd.xlane.f32.xlu1 %v2268_v29  ;;  %v2197_v35 = vmul.f32 %v4668_v43, %v2129_v25 }
 0x334   :  { %v2283_v32 = vsel %vm646_vm2, %v2199_v30, 0.0  ;;  %v2200_v33 = vmul.f32 %v4668_v43, %v2132_v28 }
 0x335   :  { %v3555_v34 = vpop.f32.mrb[76].mxu1  ;;  %v2198_v40 = vmul.f32 %v4668_v43, %v2130_v31  ;;  %v2277_v49 = vsel %vm646_vm2, %v2197_v35, 0.0 }
 0x336   :  { %v1923_v36 = vadd.f32 %v3555_v34, %v4663_v39  ;;  %v1914_v37 = vpop.f32.mrb[77].mxu1  ;;  %2284 = vadd.xlane.f32.xlu0 %v2283_v32  ;;  %v2286_v61 = vsel %vm646_vm2, %v2200_v33, 0.0 }
 0x337   :  { %v1915_v41 = vadd.f32 %v1914_v37, %v4663_v39  ;;  %v3556_v42 = vpop.f32.mrb[78].mxu1  ;;  %2287 = vadd.xlane.f32.xlu1 %v2286_v61  ;;  %v2280_v51 = vsel %vm646_vm2, %v2198_v40, 0.0 }
 0x338   :  { %v2135_v44 = vmax.f32 %v1923_v36, 0.0  ;;  %v1926_v45 = vadd.f32 %v3556_v42, %v4663_v39  ;;  %v1917_v46 = vpop.f32.mrb[79].mxu1 }
 0x339   :  { %v2133_v47 = vmax.f32 %v1915_v41, 0.0  ;;  %v1918_v48 = vadd.f32 %v1917_v46, %v4663_v39 }
 0x33a   :  { %v2136_v50 = vmax.f32 %v1926_v45, 0.0  ;;  %2278 = vadd.xlane.f32.xlu0 %v2277_v49  ;;  %v2203_v52 = vmul.f32 %v4668_v43, %v2135_v44 }
 0x33b   :  { %v2134_v53 = vmax.f32 %v1918_v48, 0.0  ;;  %2281 = vadd.xlane.f32.xlu1 %v2280_v51  ;;  %v2201_v57 = vmul.f32 %v4668_v43, %v2133_v47 }
 0x33c   :  { %v2295_v54 = vsel %vm646_vm2, %v2203_v52, 0.0  ;;  %v2204_v55 = vmul.f32 %v4668_v43, %v2136_v50 }
 0x33d   :  { %v3559_v56 = vpop.f32.mrb[80].mxu1  ;;  %v2202_v62 = vmul.f32 %v4668_v43, %v2134_v53  ;;  %v2289_v5 = vsel %vm646_vm2, %v2201_v57, 0.0 }
 0x33e   :  { %v1939_v58 = vadd.f32 %v3559_v56, %v4663_v39  ;;  %v1930_v59 = vpop.f32.mrb[81].mxu1  ;;  %2296 = vadd.xlane.f32.xlu0 %v2295_v54  ;;  %v2298_v60 = vsel %vm646_vm2, %v2204_v55, 0.0 }
 0x33f   :  { %v1931_v63 = vadd.f32 %v1930_v59, %v4663_v39  ;;  %v3560_v0 = vpop.f32.mrb[82].mxu1  ;;  %2299 = vadd.xlane.f32.xlu1 %v2298_v60  ;;  %v2292_v7 = vsel %vm646_vm2, %v2202_v62, 0.0 }
 0x340   :  { %v2139_v15 = vmax.f32 %v1939_v58, 0.0  ;;  %v1942_v1 = vadd.f32 %v3560_v0, %v4663_v39  ;;  %v1933_v2 = vpop.f32.mrb[83].mxu1 }
 0x341   :  { %v2137_v3 = vmax.f32 %v1931_v63, 0.0  ;;  %v1934_v4 = vadd.f32 %v1933_v2, %v4663_v39 }
 0x342   :  { %v2140_v6 = vmax.f32 %v1942_v1, 0.0  ;;  %2290 = vadd.xlane.f32.xlu0 %v2289_v5  ;;  %v2207_v8 = vmul.f32 %v4668_v43, %v2139_v15 }
 0x343   :  { %v2138_v9 = vmax.f32 %v1934_v4, 0.0  ;;  %2293 = vadd.xlane.f32.xlu1 %v2292_v7  ;;  %v2205_v13 = vmul.f32 %v4668_v43, %v2137_v3 }
 0x344   :  { %v2307_v14 = vsel %vm646_vm2, %v2207_v8, 0.0  ;;  %v2208_v10 = vmul.f32 %v4668_v43, %v2140_v6 }
 0x345   :  { %v3563_v11 = vpop.f32.mrb[84].mxu1  ;;  %v2206_v19 = vmul.f32 %v4668_v43, %v2138_v9  ;;  %v2301_v27 = vsel %vm646_vm2, %v2205_v13, 0.0 }
 0x346   :  { %v1955_v16 = vadd.f32 %v3563_v11, %v4663_v39  ;;  %v1946_v17 = vpop.f32.mrb[85].mxu1  ;;  %2308 = vadd.xlane.f32.xlu0 %v2307_v14  ;;  %v2310_v18 = vsel %vm646_vm2, %v2208_v10, 0.0 }
 0x347   :  { %v1947_v20 = vadd.f32 %v1946_v17, %v4663_v39  ;;  %v3564_v21 = vpop.f32.mrb[86].mxu1  ;;  %2311 = vadd.xlane.f32.xlu1 %v2310_v18  ;;  %v2304_v29 = vsel %vm646_vm2, %v2206_v19, 0.0 }
 0x348   :  { %v2143_v22 = vmax.f32 %v1955_v16, 0.0  ;;  %v1958_v23 = vadd.f32 %v3564_v21, %v4663_v39  ;;  %v1949_v24 = vpop.f32.mrb[87].mxu1 }
 0x349   :  { %v2141_v25 = vmax.f32 %v1947_v20, 0.0  ;;  %v1950_v26 = vadd.f32 %v1949_v24, %v4663_v39 }
 0x34a   :  { %v2144_v28 = vmax.f32 %v1958_v23, 0.0  ;;  %2302 = vadd.xlane.f32.xlu0 %v2301_v27  ;;  %v2211_v30 = vmul.f32 %v4668_v43, %v2143_v22 }
 0x34b   :  { %v2142_v31 = vmax.f32 %v1950_v26, 0.0  ;;  %2305 = vadd.xlane.f32.xlu1 %v2304_v29  ;;  %v2209_v35 = vmul.f32 %v4668_v43, %v2141_v25 }
 0x34c   :  { %v2319_v32 = vsel %vm646_vm2, %v2211_v30, 0.0  ;;  %v2212_v33 = vmul.f32 %v4668_v43, %v2144_v28 }
 0x34d   :  { %v3567_v34 = vpop.f32.mrb[88].mxu1  ;;  %v2210_v40 = vmul.f32 %v4668_v43, %v2142_v31  ;;  %v2313_v49 = vsel %vm646_vm2, %v2209_v35, 0.0 }
 0x34e   :  { %v1971_v36 = vadd.f32 %v3567_v34, %v4663_v39  ;;  %v1962_v37 = vpop.f32.mrb[89].mxu1  ;;  %2320 = vadd.xlane.f32.xlu0 %v2319_v32  ;;  %v2322_v61 = vsel %vm646_vm2, %v2212_v33, 0.0 }
 0x34f   :  { %v1963_v41 = vadd.f32 %v1962_v37, %v4663_v39  ;;  %v3568_v42 = vpop.f32.mrb[90].mxu1  ;;  %2323 = vadd.xlane.f32.xlu1 %v2322_v61  ;;  %v2316_v51 = vsel %vm646_vm2, %v2210_v40, 0.0 }
 0x350   :  { %v2147_v44 = vmax.f32 %v1971_v36, 0.0  ;;  %v1974_v45 = vadd.f32 %v3568_v42, %v4663_v39  ;;  %v1965_v46 = vpop.f32.mrb[91].mxu1 }
 0x351   :  { %v2145_v47 = vmax.f32 %v1963_v41, 0.0  ;;  %v1966_v48 = vadd.f32 %v1965_v46, %v4663_v39 }
 0x352   :  { %v2148_v50 = vmax.f32 %v1974_v45, 0.0  ;;  %2314 = vadd.xlane.f32.xlu0 %v2313_v49  ;;  %v2215_v52 = vmul.f32 %v4668_v43, %v2147_v44 }
 0x353   :  { %v2146_v53 = vmax.f32 %v1966_v48, 0.0  ;;  %2317 = vadd.xlane.f32.xlu1 %v2316_v51  ;;  %v2213_v57 = vmul.f32 %v4668_v43, %v2145_v47 }
 0x354   :  { %v2331_v54 = vsel %vm646_vm2, %v2215_v52, 0.0  ;;  %v2216_v55 = vmul.f32 %v4668_v43, %v2148_v50 }
 0x355   :  { %v3571_v56 = vpop.f32.mrb[92].mxu1  ;;  %v2214_v62 = vmul.f32 %v4668_v43, %v2146_v53  ;;  %v2325_v5 = vsel %vm646_vm2, %v2213_v57, 0.0 }
 0x356   :  { %v1987_v58 = vadd.f32 %v3571_v56, %v4663_v39  ;;  %v1978_v59 = vpop.f32.mrb[93].mxu1  ;;  %2332 = vadd.xlane.f32.xlu0 %v2331_v54  ;;  %v2334_v60 = vsel %vm646_vm2, %v2216_v55, 0.0 }
 0x357   :  { %v1979_v63 = vadd.f32 %v1978_v59, %v4663_v39  ;;  %v3572_v0 = vpop.f32.mrb[94].mxu1  ;;  %2335 = vadd.xlane.f32.xlu1 %v2334_v60  ;;  %v2328_v7 = vsel %vm646_vm2, %v2214_v62, 0.0 }
 0x358   :  { %v2151_v15 = vmax.f32 %v1987_v58, 0.0  ;;  %v1990_v1 = vadd.f32 %v3572_v0, %v4663_v39  ;;  %v1981_v2 = vpop.f32.mrb[95].mxu1 }
 0x359   :  { %v2149_v3 = vmax.f32 %v1979_v63, 0.0  ;;  %v1982_v4 = vadd.f32 %v1981_v2, %v4663_v39 }
 0x35a   :  { %v2152_v6 = vmax.f32 %v1990_v1, 0.0  ;;  %2326 = vadd.xlane.f32.xlu0 %v2325_v5  ;;  %v2219_v8 = vmul.f32 %v4668_v43, %v2151_v15 }
 0x35b   :  { %v2150_v9 = vmax.f32 %v1982_v4, 0.0  ;;  %2329 = vadd.xlane.f32.xlu1 %v2328_v7  ;;  %v2217_v13 = vmul.f32 %v4668_v43, %v2149_v3 }
 0x35c   :  { %v2343_v14 = vsel %vm646_vm2, %v2219_v8, 0.0  ;;  %v2220_v10 = vmul.f32 %v4668_v43, %v2152_v6 }
 0x35d   :  { %v3575_v11 = vpop.f32.mrb[96].mxu1  ;;  %v2218_v19 = vmul.f32 %v4668_v43, %v2150_v9  ;;  %v2337_v27 = vsel %vm646_vm2, %v2217_v13, 0.0 }
 0x35e   :  { %v2003_v16 = vadd.f32 %v3575_v11, %v4663_v39  ;;  %v1994_v17 = vpop.f32.mrb[97].mxu1  ;;  %2344 = vadd.xlane.f32.xlu0 %v2343_v14  ;;  %v2346_v18 = vsel %vm646_vm2, %v2220_v10, 0.0 }
 0x35f   :  { %v1995_v20 = vadd.f32 %v1994_v17, %v4663_v39  ;;  %v3576_v21 = vpop.f32.mrb[98].mxu1  ;;  %2347 = vadd.xlane.f32.xlu1 %v2346_v18  ;;  %v2340_v29 = vsel %vm646_vm2, %v2218_v19, 0.0 }
 0x360   :  { %v2155_v22 = vmax.f32 %v2003_v16, 0.0  ;;  %v2006_v23 = vadd.f32 %v3576_v21, %v4663_v39  ;;  %v1997_v24 = vpop.f32.mrb[99].mxu1 }
 0x361   :  { %v2153_v25 = vmax.f32 %v1995_v20, 0.0  ;;  %v1998_v26 = vadd.f32 %v1997_v24, %v4663_v39 }
 0x362   :  { %v2156_v28 = vmax.f32 %v2006_v23, 0.0  ;;  %2338 = vadd.xlane.f32.xlu0 %v2337_v27  ;;  %v2223_v30 = vmul.f32 %v4668_v43, %v2155_v22 }
 0x363   :  { %v2154_v31 = vmax.f32 %v1998_v26, 0.0  ;;  %2341 = vadd.xlane.f32.xlu1 %v2340_v29  ;;  %v2221_v35 = vmul.f32 %v4668_v43, %v2153_v25 }
 0x364   :  { %v2355_v32 = vsel %vm646_vm2, %v2223_v30, 0.0  ;;  %v2224_v33 = vmul.f32 %v4668_v43, %v2156_v28 }
 0x365   :  { %v3579_v34 = vpop.f32.mrb[100].mxu1  ;;  %v2222_v40 = vmul.f32 %v4668_v43, %v2154_v31  ;;  %v2349_v49 = vsel %vm646_vm2, %v2221_v35, 0.0 }
 0x366   :  { %v2019_v36 = vadd.f32 %v3579_v34, %v4663_v39  ;;  %v2010_v37 = vpop.f32.mrb[101].mxu1  ;;  %2356 = vadd.xlane.f32.xlu0 %v2355_v32  ;;  %v2358_v61 = vsel %vm646_vm2, %v2224_v33, 0.0 }
 0x367   :  { %v2011_v41 = vadd.f32 %v2010_v37, %v4663_v39  ;;  %v3580_v42 = vpop.f32.mrb[102].mxu1  ;;  %2359 = vadd.xlane.f32.xlu1 %v2358_v61  ;;  %v2352_v51 = vsel %vm646_vm2, %v2222_v40, 0.0 }
 0x368   :  { %v2159_v44 = vmax.f32 %v2019_v36, 0.0  ;;  %v2022_v45 = vadd.f32 %v3580_v42, %v4663_v39  ;;  %v2013_v46 = vpop.f32.mrb[103].mxu1 }
 0x369   :  { %v2157_v47 = vmax.f32 %v2011_v41, 0.0  ;;  %v2014_v48 = vadd.f32 %v2013_v46, %v4663_v39 }
 0x36a   :  { %v2160_v50 = vmax.f32 %v2022_v45, 0.0  ;;  %2350 = vadd.xlane.f32.xlu0 %v2349_v49  ;;  %v2227_v52 = vmul.f32 %v4668_v43, %v2159_v44 }
 0x36b   :  { %v2158_v53 = vmax.f32 %v2014_v48, 0.0  ;;  %2353 = vadd.xlane.f32.xlu1 %v2352_v51  ;;  %v2225_v57 = vmul.f32 %v4668_v43, %v2157_v47 }
 0x36c   :  { %v2367_v54 = vsel %vm646_vm2, %v2227_v52, 0.0  ;;  %v2228_v55 = vmul.f32 %v4668_v43, %v2160_v50 }
 0x36d   :  { %v3583_v56 = vpop.f32.mrb[104].mxu1  ;;  %v2226_v62 = vmul.f32 %v4668_v43, %v2158_v53  ;;  %v2361_v5 = vsel %vm646_vm2, %v2225_v57, 0.0 }
 0x36e   :  { %v2035_v58 = vadd.f32 %v3583_v56, %v4663_v39  ;;  %v2026_v59 = vpop.f32.mrb[105].mxu1  ;;  %2368 = vadd.xlane.f32.xlu0 %v2367_v54  ;;  %v2370_v60 = vsel %vm646_vm2, %v2228_v55, 0.0 }
 0x36f   :  { %v2027_v63 = vadd.f32 %v2026_v59, %v4663_v39  ;;  %v3584_v0 = vpop.f32.mrb[106].mxu1  ;;  %2371 = vadd.xlane.f32.xlu1 %v2370_v60  ;;  %v2364_v7 = vsel %vm646_vm2, %v2226_v62, 0.0 }
 0x370   :  { %v2163_v15 = vmax.f32 %v2035_v58, 0.0  ;;  %v2038_v1 = vadd.f32 %v3584_v0, %v4663_v39  ;;  %v2029_v2 = vpop.f32.mrb[107].mxu1 }
 0x371   :  { %v2161_v3 = vmax.f32 %v2027_v63, 0.0  ;;  %v2030_v4 = vadd.f32 %v2029_v2, %v4663_v39 }
 0x372   :  { %v2164_v6 = vmax.f32 %v2038_v1, 0.0  ;;  %2362 = vadd.xlane.f32.xlu0 %v2361_v5  ;;  %v2231_v8 = vmul.f32 %v4668_v43, %v2163_v15 }
 0x373   :  { %v2162_v9 = vmax.f32 %v2030_v4, 0.0  ;;  %2365 = vadd.xlane.f32.xlu1 %v2364_v7  ;;  %v2229_v13 = vmul.f32 %v4668_v43, %v2161_v3 }
 0x374   :  { %v2379_v14 = vsel %vm646_vm2, %v2231_v8, 0.0  ;;  %v2232_v10 = vmul.f32 %v4668_v43, %v2164_v6 }
 0x375   :  { %v3587_v11 = vpop.f32.mrb[108].mxu1  ;;  %v2230_v19 = vmul.f32 %v4668_v43, %v2162_v9  ;;  %v2373_v27 = vsel %vm646_vm2, %v2229_v13, 0.0 }
 0x376   :  { %v2051_v16 = vadd.f32 %v3587_v11, %v4663_v39  ;;  %v2042_v17 = vpop.f32.mrb[109].mxu1  ;;  %2380 = vadd.xlane.f32.xlu0 %v2379_v14  ;;  %v2382_v18 = vsel %vm646_vm2, %v2232_v10, 0.0 }
 0x377   :  { %v2043_v20 = vadd.f32 %v2042_v17, %v4663_v39  ;;  %v3588_v21 = vpop.f32.mrb[110].mxu1  ;;  %2383 = vadd.xlane.f32.xlu1 %v2382_v18  ;;  %v2376_v29 = vsel %vm646_vm2, %v2230_v19, 0.0 }
 0x378   :  { %v2167_v22 = vmax.f32 %v2051_v16, 0.0  ;;  %v2054_v23 = vadd.f32 %v3588_v21, %v4663_v39  ;;  %v2045_v24 = vpop.f32.mrb[111].mxu1 }
 0x379   :  { %v2165_v25 = vmax.f32 %v2043_v20, 0.0  ;;  %v2046_v26 = vadd.f32 %v2045_v24, %v4663_v39 }
 0x37a   :  { %v2168_v28 = vmax.f32 %v2054_v23, 0.0  ;;  %2374 = vadd.xlane.f32.xlu0 %v2373_v27  ;;  %v2235_v30 = vmul.f32 %v4668_v43, %v2167_v22 }
 0x37b   :  { %v2166_v31 = vmax.f32 %v2046_v26, 0.0  ;;  %2377 = vadd.xlane.f32.xlu1 %v2376_v29  ;;  %v2233_v35 = vmul.f32 %v4668_v43, %v2165_v25 }
 0x37c   :  { %v2391_v32 = vsel %vm646_vm2, %v2235_v30, 0.0  ;;  %v2236_v33 = vmul.f32 %v4668_v43, %v2168_v28 }
 0x37d   :  { %v3591_v34 = vpop.f32.mrb[112].mxu1  ;;  %v2234_v40 = vmul.f32 %v4668_v43, %v2166_v31  ;;  %v2385_v49 = vsel %vm646_vm2, %v2233_v35, 0.0 }
 0x37e   :  { %v2067_v36 = vadd.f32 %v3591_v34, %v4663_v39  ;;  %v2058_v37 = vpop.f32.mrb[113].mxu1  ;;  %2392 = vadd.xlane.f32.xlu0 %v2391_v32  ;;  %v2394_v61 = vsel %vm646_vm2, %v2236_v33, 0.0 }
 0x37f   :  { %v2059_v41 = vadd.f32 %v2058_v37, %v4663_v39  ;;  %v3592_v42 = vpop.f32.mrb[114].mxu1  ;;  %2395 = vadd.xlane.f32.xlu1 %v2394_v61  ;;  %v2388_v51 = vsel %vm646_vm2, %v2234_v40, 0.0 }
 0x380   :  { %v2171_v44 = vmax.f32 %v2067_v36, 0.0  ;;  %v2070_v45 = vadd.f32 %v3592_v42, %v4663_v39  ;;  %v2061_v46 = vpop.f32.mrb[115].mxu1 }
 0x381   :  { %v2169_v47 = vmax.f32 %v2059_v41, 0.0  ;;  %v2062_v48 = vadd.f32 %v2061_v46, %v4663_v39 }
 0x382   :  { %v2172_v50 = vmax.f32 %v2070_v45, 0.0  ;;  %2386 = vadd.xlane.f32.xlu0 %v2385_v49  ;;  %v2239_v52 = vmul.f32 %v4668_v43, %v2171_v44 }
 0x383   :  { %v2170_v53 = vmax.f32 %v2062_v48, 0.0  ;;  %2389 = vadd.xlane.f32.xlu1 %v2388_v51  ;;  %v2237_v57 = vmul.f32 %v4668_v43, %v2169_v47 }
 0x384   :  { %v2403_v54 = vsel %vm646_vm2, %v2239_v52, 0.0  ;;  %v2240_v55 = vmul.f32 %v4668_v43, %v2172_v50 }
 0x385   :  { %v3595_v56 = vpop.f32.mrb[116].mxu1  ;;  %v2238_v62 = vmul.f32 %v4668_v43, %v2170_v53  ;;  %v2397_v5 = vsel %vm646_vm2, %v2237_v57, 0.0 }
 0x386   :  { %v2083_v58 = vadd.f32 %v3595_v56, %v4663_v39  ;;  %v2074_v59 = vpop.f32.mrb[117].mxu1  ;;  %2404 = vadd.xlane.f32.xlu0 %v2403_v54  ;;  %v2406_v60 = vsel %vm646_vm2, %v2240_v55, 0.0 }
 0x387   :  { %v2075_v63 = vadd.f32 %v2074_v59, %v4663_v39  ;;  %v3596_v0 = vpop.f32.mrb[118].mxu1  ;;  %2407 = vadd.xlane.f32.xlu1 %v2406_v60  ;;  %v2400_v7 = vsel %vm646_vm2, %v2238_v62, 0.0  ;;  %v2447_v60 = vsub.s32 4, %v4443_v12 }
 0x388   :  { %v2175_v15 = vmax.f32 %v2083_v58, 0.0  ;;  %v2086_v1 = vadd.f32 %v3596_v0, %v4663_v39  ;;  %v2077_v2 = vpop.f32.mrb[119].mxu1 }
 0x389   :  { %v2173_v3 = vmax.f32 %v2075_v63, 0.0  ;;  %v2078_v4 = vadd.f32 %v2077_v2, %v4663_v39  ;;  %v4863_v62 = vrot.slane %v4660_v38, %v2447_v60 }
 0x38a   :  { %v2176_v6 = vmax.f32 %v2086_v1, 0.0  ;;  %2398 = vadd.xlane.f32.xlu0 %v2397_v5  ;;  %v2243_v8 = vmul.f32 %v4668_v43, %v2175_v15 }
 0x38b   :  { %v2174_v9 = vmax.f32 %v2078_v4, 0.0  ;;  %2401 = vadd.xlane.f32.xlu1 %v2400_v7  ;;  %v2241_v13 = vmul.f32 %v4668_v43, %v2173_v3 }
 0x38c   :  { %v2415_v14 = vsel %vm646_vm2, %v2243_v8, 0.0  ;;  %v2244_v10 = vmul.f32 %v4668_v43, %v2176_v6 }
 0x38d   :  { %v3599_v11 = vpop.f32.mrb[120].mxu1  ;;  %v2242_v19 = vmul.f32 %v4668_v43, %v2174_v9  ;;  %v2409_v27 = vsel %vm646_vm2, %v2241_v13, 0.0 }
 0x38e   :  { %v2099_v16 = vadd.f32 %v3599_v11, %v4663_v39  ;;  %v2090_v17 = vpop.f32.mrb[121].mxu1  ;;  %2416 = vadd.xlane.f32.xlu0 %v2415_v14  ;;  %v2418_v18 = vsel %vm646_vm2, %v2244_v10, 0.0 }
 0x38f   :  { %v2091_v20 = vadd.f32 %v2090_v17, %v4663_v39  ;;  %v3600_v21 = vpop.f32.mrb[122].mxu1  ;;  %2419 = vadd.xlane.f32.xlu1 %v2418_v18  ;;  %v2412_v29 = vsel %vm646_vm2, %v2242_v19, 0.0 }
 0x390   :  { %v2179_v22 = vmax.f32 %v2099_v16, 0.0  ;;  %v2102_v23 = vadd.f32 %v3600_v21, %v4663_v39  ;;  %v2093_v24 = vpop.f32.mrb[123].mxu1 }
 0x391   :  { %v2177_v25 = vmax.f32 %v2091_v20, 0.0  ;;  %v2094_v26 = vadd.f32 %v2093_v24, %v4663_v39 }
 0x392   :  { %v2180_v28 = vmax.f32 %v2102_v23, 0.0  ;;  %2410 = vadd.xlane.f32.xlu0 %v2409_v27  ;;  %v2247_v30 = vmul.f32 %v4668_v43, %v2179_v22 }
 0x393   :  { %v2178_v31 = vmax.f32 %v2094_v26, 0.0  ;;  %2413 = vadd.xlane.f32.xlu1 %v2412_v29  ;;  %v2245_v35 = vmul.f32 %v4668_v43, %v2177_v25 }
 0x394   :  { %v2427_v32 = vsel %vm646_vm2, %v2247_v30, 0.0  ;;  %v2248_v33 = vmul.f32 %v4668_v43, %v2180_v28 }
 0x395   :  { %v3603_v34 = vpop.f32.mrb[124].mxu1  ;;  %v2246_v40 = vmul.f32 %v4668_v43, %v2178_v31  ;;  %v2421_v49 = vsel %vm646_vm2, %v2245_v35, 0.0 }
 0x396   :  { %v2115_v36 = vadd.f32 %v3603_v34, %v4663_v39  ;;  %2428 = vadd.xlane.f32.xlu0 %v2427_v32  ;;  %v2106_v37 = vpop.f32.mrb[125].mxu1  ;;  %v2430_v61 = vsel %vm646_vm2, %v2248_v33, 0.0 }
 0x397   :  { %v2107_v41 = vadd.f32 %v2106_v37, %v4663_v39  ;;  %2431 = vadd.xlane.f32.xlu1 %v2430_v61  ;;  %v3604_v42 = vpop.f32.mrb[126].mxu1  ;;  %v2424_v50 = vsel %vm646_vm2, %v2246_v40, 0.0 }
 0x398   :  { %v2118_v44 = vadd.f32 %v3604_v42, %v4663_v39  ;;  %v2109_v45 = vpop.f32.mrb[127].mxu1  ;;  %v2183_v46 = vmax.f32 %v2115_v36, 0.0 }
 0x399   :  { %v2181_v47 = vmax.f32 %v2107_v41, 0.0  ;;  %v2110_v48 = vadd.f32 %v2109_v45, %v4663_v39 }
 0x39a   :  { %2422 = vadd.xlane.f32.xlu0 %v2421_v49  ;;  %v2184_v51 = vmax.f32 %v2118_v44, 0.0  ;;  %v2251_v56 = vmul.f32 %v4668_v43, %v2183_v46 }
 0x39b   :  { %v2182_v52 = vmax.f32 %v2110_v48, 0.0  ;;  %2425 = vadd.xlane.f32.xlu1 %v2424_v50  ;;  %v2249_v53 = vmul.f32 %v4668_v43, %v2181_v47 }
 0x39c   :  { %v2252_v39 = vmul.f32 %v4668_v43, %v2184_v51  ;;  %v2439_v58 = vsel %vm646_vm2, %v2251_v56, 0.0 }
 0x39d   :  { %v2433_v54 = vsel %vm646_vm2, %v2249_v53, 0.0  ;;  %v2250_v55 = vmul.f32 %v4668_v43, %v2182_v52 }
 0x39e   :  { %2434 = vadd.xlane.f32.xlu0 %v2433_v54  ;;  %v2442_v59 = vsel %vm646_vm2, %v2252_v39, 0.0 }
 0x39f   :  { %v2436_v57 = vsel %vm646_vm2, %v2250_v55, 0.0 }
 0x3a0   :  { %2437 = vadd.xlane.f32.xlu1 %v2436_v57 }
 0x3a2   :  { %2440 = vadd.xlane.f32.xlu0 %v2439_v58 }
 0x3a4   :  { %2443 = vadd.xlane.f32.xlu1 %v2442_v59 }
 0x3b2   :  { %v2261_v63 = vpop.xlane.xlu1 %2260 }
 0x3b3   :  { %v2451_v0 = vadd.f32 %v4863_v62, %v2261_v63  ;;  %v2255_v15 = vpop.xlane.xlu0 %2254 }
 0x3b4   :  { %v2449_v1 = vadd.f32 %v4863_v62, %v2255_v15 }
 0x3b5   :  { %v3123_v2 = vmul.f32 -1.442695, %v2451_v0 }
 0x3b6   :  { %v3121_v43 = vmul.f32 -1.442695, %v2449_v1  ;;  %v2264_v3 = vpop.xlane.xlu1 %2263 }
 0x3b7   :  { %3683 = vpow2.f32 %v3123_v2  ;;  %v2452_v4 = vadd.f32 %v4863_v62, %v2264_v3  ;;  %v2258_v5 = vpop.xlane.xlu0 %2257 }
 0x3b8   :  { %3685 = vpow2.f32 %v3121_v43  ;;  %v2450_v6 = vadd.f32 %v4863_v62, %v2258_v5 }
 0x3b9   :  { %v3124_v12 = vmul.f32 -1.442695, %v2452_v4 }
 0x3ba   :  { %v3122_v7 = vmul.f32 -1.442695, %v2450_v6 }
 0x3bb   :  { %3687 = vpow2.f32 %v3124_v12  ;;  %v2273_v38 = vpop.xlane.xlu0 %2272 }
 0x3bc   :  { %3689 = vpow2.f32 %v3122_v7  ;;  %v2455_v8 = vadd.f32 %v4863_v62, %v2273_v38  ;;  %v2276_v9 = vpop.xlane.xlu1 %2275 }
 0x3bd   :  { %v2456_v14 = vadd.f32 %v4863_v62, %v2276_v9 }
 0x3be   :  { %v3127_v10 = vmul.f32 -1.442695, %v2455_v8 }
 0x3bf   :  { %v3128_v11 = vmul.f32 -1.442695, %v2456_v14  ;;  %v2267_v13 = vpop.xlane.xlu0 %2266 }
 0x3c0   :  { %3691 = vpow2.f32 %v3127_v10  ;;  %v2453_v16 = vadd.f32 %v4863_v62, %v2267_v13  ;;  %v2270_v17 = vpop.xlane.xlu1 %2269 }
 0x3c1   :  { %v3684_v18 = vpop.eup %3683  ;;  %3693 = vpow2.f32 %v3128_v11  ;;  %v2454_v19 = vadd.f32 %v4863_v62, %v2270_v17 }
 0x3c2   :  { %v3686_v20 = vpop.eup %3685  ;;  %v2707_v21 = vadd.f32 1.0, %v3684_v18  ;;  %v3125_v22 = vmul.f32 -1.442695, %v2453_v16 }
 0x3c3   :  { %v2705_v23 = vadd.f32 1.0, %v3686_v20  ;;  %v3126_v24 = vmul.f32 -1.442695, %v2454_v19  ;;  %v2285_v25 = vpop.xlane.xlu0 %2284 }
 0x3c4   :  { %3695 = vrcp.f32 %v2707_v21  ;;  %v2459_v26 = vadd.f32 %v4863_v62, %v2285_v25  ;;  %v2288_v27 = vpop.xlane.xlu1 %2287 }
 0x3c5   :  { %v3688_v28 = vpop.eup %3687  ;;  %3697 = vrcp.f32 %v2705_v23  ;;  %v2460_v29 = vadd.f32 %v4863_v62, %v2288_v27 }
 0x3c6   :  { %v3690_v30 = vpop.eup %3689  ;;  %v2708_v31 = vadd.f32 1.0, %v3688_v28  ;;  %3699 = vpow2.f32 %v3125_v22  ;;  %v3131_v32 = vmul.f32 -1.442695, %v2459_v26 }
 0x3c7   :  { %v2706_v33 = vadd.f32 1.0, %v3690_v30  ;;  %3701 = vpow2.f32 %v3126_v24  ;;  %v3132_v34 = vmul.f32 -1.442695, %v2460_v29  ;;  %v2279_v35 = vpop.xlane.xlu0 %2278 }
 0x3c8   :  { %3703 = vrcp.f32 %v2708_v31  ;;  %v2457_v36 = vadd.f32 %v4863_v62, %v2279_v35  ;;  %v2282_v37 = vpop.xlane.xlu1 %2281 }
 0x3c9   :  { %3705 = vrcp.f32 %v2706_v33  ;;  %v2458_v61 = vadd.f32 %v4863_v62, %v2282_v37 }
 0x3ca   :  { %v3692_v40 = vpop.eup %3691  ;;  %3707 = vpow2.f32 %v3131_v32  ;;  %v3129_v41 = vmul.f32 -1.442695, %v2457_v36 }
 0x3cb   :  { %v3694_v42 = vpop.eup %3693  ;;  %v2711_v44 = vadd.f32 1.0, %v3692_v40  ;;  %3709 = vpow2.f32 %v3132_v34  ;;  %v3130_v45 = vmul.f32 -1.442695, %v2458_v61  ;;  %v2297_v46 = vpop.xlane.xlu0 %2296 }
 0x3cc   :  { %v2712_v47 = vadd.f32 1.0, %v3694_v42  ;;  %3711 = vpow2.f32 %v3129_v41  ;;  %v2463_v48 = vadd.f32 %v4863_v62, %v2297_v46  ;;  %v2300_v49 = vpop.xlane.xlu1 %2299 }
 0x3cd   :  { %3713 = vrcp.f32 %v2711_v44  ;;  %v2464_v50 = vadd.f32 %v4863_v62, %v2300_v49 }
 0x3ce   :  { %v3696_v51 = vpop.eup %3695  ;;  %3715 = vrcp.f32 %v2712_v47  ;;  %v3135_v52 = vmul.f32 -1.442695, %v2463_v48 }
 0x3cf   :  { %v3698_v53 = vpop.eup %3697  ;;  %2900 = vst.msk [vmem:[%s5189_s4 + $0x10] sm:$0xff] %vm2897_vm6, %v3696_v51  ;;  %3717 = vpow2.f32 %v3130_v45  ;;  %v3136_v54 = vmul.f32 -1.442695, %v2464_v50  ;;  %v2291_v55 = vpop.xlane.xlu0 %2290 }
 0x3d0   :  { %v3700_v56 = vpop.eup %3699  ;;  %2898 = vst.msk [vmem:[%s5189_s4] sm:$0xff] %vm2897_vm6, %v3698_v53  ;;  %3719 = vpow2.f32 %v3135_v52  ;;  %v2461_v57 = vadd.f32 %v4863_v62, %v2291_v55  ;;  %v2294_v39 = vpop.xlane.xlu1 %2293 }
 0x3d1   :  { %v3702_v58 = vpop.eup %3701  ;;  %v2709_v59 = vadd.f32 1.0, %v3700_v56  ;;  %3721 = vpow2.f32 %v3136_v54  ;;  %v2462_v60 = vadd.f32 %v4863_v62, %v2294_v39 }
 0x3d2   :  { %v3704_v63 = vpop.eup %3703  ;;  %v2710_v0 = vadd.f32 1.0, %v3702_v58  ;;  %v3133_v15 = vmul.f32 -1.442695, %v2461_v57 }
 0x3d3   :  { %v3706_v1 = vpop.eup %3705  ;;  %2901 = vst.msk [vmem:[%s5189_s4 + $0x18] sm:$0xff] %vm2897_vm6, %v3704_v63  ;;  %3723 = vrcp.f32 %v2709_v59  ;;  %v3134_v2 = vmul.f32 -1.442695, %v2462_v60  ;;  %v2309_v43 = vpop.xlane.xlu0 %2308 }
 0x3d4   :  { %v3708_v3 = vpop.eup %3707  ;;  %2899 = vst.msk [vmem:[%s5189_s4 + $0x8] sm:$0xff] %vm2897_vm6, %v3706_v1  ;;  %3725 = vrcp.f32 %v2710_v0  ;;  %v2467_v4 = vadd.f32 %v4863_v62, %v2309_v43  ;;  %v2312_v5 = vpop.xlane.xlu1 %2311 }
 0x3d5   :  { %v3710_v6 = vpop.eup %3709  ;;  %v2715_v12 = vadd.f32 1.0, %v3708_v3  ;;  %3727 = vpow2.f32 %v3133_v15  ;;  %v2468_v7 = vadd.f32 %v4863_v62, %v2312_v5 }
 0x3d6   :  { %v3712_v38 = vpop.eup %3711  ;;  %v2716_v8 = vadd.f32 1.0, %v3710_v6  ;;  %3729 = vpow2.f32 %v3134_v2  ;;  %v3139_v9 = vmul.f32 -1.442695, %v2467_v4 }
 0x3d7   :  { %v3714_v14 = vpop.eup %3713  ;;  %3731 = vrcp.f32 %v2715_v12  ;;  %v2713_v10 = vadd.f32 1.0, %v3712_v38  ;;  %v3140_v11 = vmul.f32 -1.442695, %v2468_v7  ;;  %v2303_v13 = vpop.xlane.xlu0 %2302 }
 0x3d8   :  { %v3716_v16 = vpop.eup %3715  ;;  %2904 = vst.msk [vmem:[%s5189_s4 + $0x30] sm:$0xff] %vm2897_vm6, %v3714_v14  ;;  %3733 = vrcp.f32 %v2716_v8  ;;  %v2465_v17 = vadd.f32 %v4863_v62, %v2303_v13  ;;  %v2306_v18 = vpop.xlane.xlu1 %2305 }
 0x3d9   :  { %v3718_v19 = vpop.eup %3717  ;;  %2905 = vst.msk [vmem:[%s5189_s4 + $0x38] sm:$0xff] %vm2897_vm6, %v3716_v16  ;;  %3735 = vrcp.f32 %v2713_v10  ;;  %v2466_v20 = vadd.f32 %v4863_v62, %v2306_v18 }
 0x3da   :  { %v3720_v21 = vpop.eup %3719  ;;  %v2714_v22 = vadd.f32 1.0, %v3718_v19  ;;  %3737 = vpow2.f32 %v3139_v9  ;;  %v3137_v25 = vmul.f32 -1.442695, %v2465_v17 }
 0x3db   :  { %v3722_v23 = vpop.eup %3721  ;;  %v2719_v24 = vadd.f32 1.0, %v3720_v21  ;;  %3739 = vpow2.f32 %v3140_v11  ;;  %v2321_v26 = vpop.xlane.xlu0 %2320  ;;  %v3138_v28 = vmul.f32 -1.442695, %v2466_v20 }
 0x3dc   :  { %3741 = vrcp.f32 %v2714_v22  ;;  %v2720_v27 = vadd.f32 1.0, %v3722_v23  ;;  %v2471_v29 = vadd.f32 %v4863_v62, %v2321_v26  ;;  %v2324_v30 = vpop.xlane.xlu1 %2323 }
 0x3dd   :  { %v3724_v31 = vpop.eup %3723  ;;  %3743 = vrcp.f32 %v2719_v24  ;;  %v2472_v32 = vadd.f32 %v4863_v62, %v2324_v30 }
 0x3de   :  { %v3726_v33 = vpop.eup %3725  ;;  %2902 = vst.msk [vmem:[%s5189_s4 + $0x20] sm:$0xff] %vm2897_vm6, %v3724_v31  ;;  %3745 = vrcp.f32 %v2720_v27  ;;  %v3143_v34 = vmul.f32 -1.442695, %v2471_v29 }
 0x3df   :  { %v3728_v35 = vpop.eup %3727  ;;  %2903 = vst.msk [vmem:[%s5189_s4 + $0x28] sm:$0xff] %vm2897_vm6, %v3726_v33  ;;  %3747 = vpow2.f32 %v3137_v25  ;;  %v2315_v36 = vpop.xlane.xlu0 %2314  ;;  %v3144_v40 = vmul.f32 -1.442695, %v2472_v32 }
 0x3e0   :  { %v3730_v37 = vpop.eup %3729  ;;  %v2717_v61 = vadd.f32 1.0, %v3728_v35  ;;  %3749 = vpow2.f32 %v3138_v28  ;;  %v2469_v41 = vadd.f32 %v4863_v62, %v2315_v36  ;;  %v2318_v42 = vpop.xlane.xlu1 %2317 }
 0x3e1   :  { %v3732_v44 = vpop.eup %3731  ;;  %v2718_v45 = vadd.f32 1.0, %v3730_v37  ;;  %3751 = vpow2.f32 %v3143_v34  ;;  %v2470_v46 = vadd.f32 %v4863_v62, %v2318_v42 }
 0x3e2   :  { %v3734_v47 = vpop.eup %3733  ;;  %2908 = vst.msk [vmem:[%s5189_s4 + $0x50] sm:$0xff] %vm2897_vm6, %v3732_v44  ;;  %3753 = vrcp.f32 %v2717_v61  ;;  %v3141_v48 = vmul.f32 -1.442695, %v2469_v41 }
 0x3e3   :  { %v3736_v49 = vpop.eup %3735  ;;  %2909 = vst.msk [vmem:[%s5189_s4 + $0x58] sm:$0xff] %vm2897_vm6, %v3734_v47  ;;  %3755 = vrcp.f32 %v2718_v45  ;;  %v3142_v50 = vmul.f32 -1.442695, %v2470_v46  ;;  %v2333_v51 = vpop.xlane.xlu0 %2332 }
 0x3e4   :  { %v3738_v52 = vpop.eup %3737  ;;  %2906 = vst.msk [vmem:[%s5189_s4 + $0x40] sm:$0xff] %vm2897_vm6, %v3736_v49  ;;  %3757 = vpow2.f32 %v3144_v40  ;;  %v2475_v53 = vadd.f32 %v4863_v62, %v2333_v51  ;;  %v2336_v54 = vpop.xlane.xlu1 %2335 }
 0x3e5   :  { %v3740_v55 = vpop.eup %3739  ;;  %v2723_v56 = vadd.f32 1.0, %v3738_v52  ;;  %3759 = vpow2.f32 %v3141_v48  ;;  %v2476_v57 = vadd.f32 %v4863_v62, %v2336_v54 }
 0x3e6   :  { %v3742_v39 = vpop.eup %3741  ;;  %v2724_v58 = vadd.f32 1.0, %v3740_v55  ;;  %3761 = vpow2.f32 %v3142_v50  ;;  %v3147_v59 = vmul.f32 -1.442695, %v2475_v53 }
 0x3e7   :  { %v3744_v60 = vpop.eup %3743  ;;  %2907 = vst.msk [vmem:[%s5189_s4 + $0x48] sm:$0xff] %vm2897_vm6, %v3742_v39  ;;  %3763 = vrcp.f32 %v2723_v56  ;;  %v3148_v63 = vmul.f32 -1.442695, %v2476_v57  ;;  %v2327_v0 = vpop.xlane.xlu0 %2326 }
 0x3e8   :  { %v3746_v15 = vpop.eup %3745  ;;  %2912 = vst.msk [vmem:[%s5189_s4 + $0x70] sm:$0xff] %vm2897_vm6, %v3744_v60  ;;  %3765 = vrcp.f32 %v2724_v58  ;;  %v2473_v1 = vadd.f32 %v4863_v62, %v2327_v0  ;;  %v2330_v2 = vpop.xlane.xlu1 %2329 }
 0x3e9   :  { %v3748_v43 = vpop.eup %3747  ;;  %2913 = vst.msk [vmem:[%s5189_s4 + $0x78] sm:$0xff] %vm2897_vm6, %v3746_v15  ;;  %3767 = vpow2.f32 %v3147_v59  ;;  %v2474_v3 = vadd.f32 %v4863_v62, %v2330_v2 }
 0x3ea   :  { %v3750_v4 = vpop.eup %3749  ;;  %v2721_v5 = vadd.f32 1.0, %v3748_v43  ;;  %3769 = vpow2.f32 %v3148_v63  ;;  %v3145_v7 = vmul.f32 -1.442695, %v2473_v1 }
 0x3eb   :  { %v3752_v6 = vpop.eup %3751  ;;  %v2722_v12 = vadd.f32 1.0, %v3750_v4  ;;  %v2345_v38 = vpop.xlane.xlu0 %2344  ;;  %v3146_v14 = vmul.f32 -1.442695, %v2474_v3 }
 0x3ec   :  { %v3754_v8 = vpop.eup %3753  ;;  %3771 = vrcp.f32 %v2721_v5  ;;  %v2727_v9 = vadd.f32 1.0, %v3752_v6  ;;  %v2479_v10 = vadd.f32 %v4863_v62, %v2345_v38  ;;  %v2348_v11 = vpop.xlane.xlu1 %2347 }
 0x3ed   :  { %v3756_v13 = vpop.eup %3755  ;;  %2910 = vst.msk [vmem:[%s5189_s4 + $0x60] sm:$0xff] %vm2897_vm6, %v3754_v8  ;;  %3773 = vrcp.f32 %v2722_v12  ;;  %v2480_v16 = vadd.f32 %v4863_v62, %v2348_v11 }
 0x3ee   :  { %v3758_v17 = vpop.eup %3757  ;;  %2911 = vst.msk [vmem:[%s5189_s4 + $0x68] sm:$0xff] %vm2897_vm6, %v3756_v13  ;;  %3775 = vrcp.f32 %v2727_v9  ;;  %v3151_v23 = vmul.f32 -1.442695, %v2479_v10 }
 0x3ef   :  { %v3760_v18 = vpop.eup %3759  ;;  %v2728_v19 = vadd.f32 1.0, %v3758_v17  ;;  %3777 = vpow2.f32 %v3145_v7  ;;  %v2339_v20 = vpop.xlane.xlu0 %2338  ;;  %v3152_v28 = vmul.f32 -1.442695, %v2480_v16 }
 0x3f0   :  { %v3762_v21 = vpop.eup %3761  ;;  %v2725_v22 = vadd.f32 1.0, %v3760_v18  ;;  %3779 = vpow2.f32 %v3146_v14  ;;  %v2477_v24 = vadd.f32 %v4863_v62, %v2339_v20  ;;  %v2342_v25 = vpop.xlane.xlu1 %2341 }
 0x3f1   :  { %v3764_v26 = vpop.eup %3763  ;;  %3781 = vrcp.f32 %v2728_v19  ;;  %v2726_v27 = vadd.f32 1.0, %v3762_v21  ;;  %v2478_v29 = vadd.f32 %v4863_v62, %v2342_v25 }
 0x3f2   :  { %v3766_v30 = vpop.eup %3765  ;;  %2916 = vst.msk [vmem:[%s5189_s4 + $0x90] sm:$0xff] %vm2897_vm6, %v3764_v26  ;;  %3783 = vrcp.f32 %v2725_v22  ;;  %v3149_v35 = vmul.f32 -1.442695, %v2477_v24 }
 0x3f3   :  { %v3768_v31 = vpop.eup %3767  ;;  %2917 = vst.msk [vmem:[%s5189_s4 + $0x98] sm:$0xff] %vm2897_vm6, %v3766_v30  ;;  %3785 = vrcp.f32 %v2726_v27  ;;  %v2357_v32 = vpop.xlane.xlu0 %2356  ;;  %v3150_v40 = vmul.f32 -1.442695, %v2478_v29 }
 0x3f4   :  { %v3770_v33 = vpop.eup %3769  ;;  %v2731_v34 = vadd.f32 1.0, %v3768_v31  ;;  %3787 = vpow2.f32 %v3151_v23  ;;  %v2483_v36 = vadd.f32 %v4863_v62, %v2357_v32  ;;  %v2360_v37 = vpop.xlane.xlu1 %2359 }
 0x3f5   :  { %v2732_v61 = vadd.f32 1.0, %v3770_v33  ;;  %3789 = vpow2.f32 %v3152_v28  ;;  %v2484_v41 = vadd.f32 %v4863_v62, %v2360_v37 }
 0x3f6   :  { %v3772_v42 = vpop.eup %3771  ;;  %3791 = vrcp.f32 %v2731_v34  ;;  %v3155_v44 = vmul.f32 -1.442695, %v2483_v36 }
 0x3f7   :  { %v3774_v45 = vpop.eup %3773  ;;  %2914 = vst.msk [vmem:[%s5189_s4 + $0x80] sm:$0xff] %vm2897_vm6, %v3772_v42  ;;  %3793 = vrcp.f32 %v2732_v61  ;;  %v3156_v46 = vmul.f32 -1.442695, %v2484_v41  ;;  %v2351_v47 = vpop.xlane.xlu0 %2350 }
 0x3f8   :  { %v3776_v48 = vpop.eup %3775  ;;  %2915 = vst.msk [vmem:[%s5189_s4 + $0x88] sm:$0xff] %vm2897_vm6, %v3774_v45  ;;  %3795 = vpow2.f32 %v3149_v35  ;;  %v2481_v49 = vadd.f32 %v4863_v62, %v2351_v47  ;;  %v2354_v50 = vpop.xlane.xlu1 %2353 }
 0x3f9   :  { %v3778_v51 = vpop.eup %3777  ;;  %2920 = vst.msk [vmem:[%s5189_s4 + $0xb0] sm:$0xff] %vm2897_vm6, %v3776_v48  ;;  %3797 = vpow2.f32 %v3150_v40  ;;  %v2482_v52 = vadd.f32 %v4863_v62, %v2354_v50 }
 0x3fa   :  { %v3780_v53 = vpop.eup %3779  ;;  %v2729_v54 = vadd.f32 1.0, %v3778_v51  ;;  %3799 = vpow2.f32 %v3155_v44  ;;  %v3153_v55 = vmul.f32 -1.442695, %v2481_v49 }
 0x3fb   :  { %v3782_v56 = vpop.eup %3781  ;;  %v2730_v57 = vadd.f32 1.0, %v3780_v53  ;;  %3801 = vpow2.f32 %v3156_v46  ;;  %v3154_v39 = vmul.f32 -1.442695, %v2482_v52  ;;  %v2369_v58 = vpop.xlane.xlu0 %2368 }
 0x3fc   :  { %v3784_v59 = vpop.eup %3783  ;;  %2921 = vst.msk [vmem:[%s5189_s4 + $0xb8] sm:$0xff] %vm2897_vm6, %v3782_v56  ;;  %3803 = vrcp.f32 %v2729_v54  ;;  %v2487_v60 = vadd.f32 %v4863_v62, %v2369_v58  ;;  %v2372_v63 = vpop.xlane.xlu1 %2371 }
 0x3fd   :  { %v3786_v0 = vpop.eup %3785  ;;  %2918 = vst.msk [vmem:[%s5189_s4 + $0xa0] sm:$0xff] %vm2897_vm6, %v3784_v59  ;;  %3805 = vrcp.f32 %v2730_v57  ;;  %v2488_v15 = vadd.f32 %v4863_v62, %v2372_v63 }
 0x3fe   :  { %v3788_v1 = vpop.eup %3787  ;;  %2919 = vst.msk [vmem:[%s5189_s4 + $0xa8] sm:$0xff] %vm2897_vm6, %v3786_v0  ;;  %3807 = vpow2.f32 %v3153_v55  ;;  %v3159_v2 = vmul.f32 -1.442695, %v2487_v60 }
 0x3ff   :  { %v3790_v43 = vpop.eup %3789  ;;  %v2735_v3 = vadd.f32 1.0, %v3788_v1  ;;  %3809 = vpow2.f32 %v3154_v39  ;;  %v3160_v4 = vmul.f32 -1.442695, %v2488_v15  ;;  %v2363_v5 = vpop.xlane.xlu0 %2362 }
 0x400   :  { %v3792_v6 = vpop.eup %3791  ;;  %v2736_v12 = vadd.f32 1.0, %v3790_v43  ;;  %3811 = vpow2.f32 %v3159_v2  ;;  %v2485_v7 = vadd.f32 %v4863_v62, %v2363_v5  ;;  %v2366_v38 = vpop.xlane.xlu1 %2365 }
 0x401   :  { %v3794_v8 = vpop.eup %3793  ;;  %2924 = vst.msk [vmem:[%s5189_s4 + $0xd0] sm:$0xff] %vm2897_vm6, %v3792_v6  ;;  %3813 = vrcp.f32 %v2735_v3  ;;  %v2486_v9 = vadd.f32 %v4863_v62, %v2366_v38 }
 0x402   :  { %v3796_v14 = vpop.eup %3795  ;;  %2925 = vst.msk [vmem:[%s5189_s4 + $0xd8] sm:$0xff] %vm2897_vm6, %v3794_v8  ;;  %3815 = vrcp.f32 %v2736_v12  ;;  %v3157_v10 = vmul.f32 -1.442695, %v2485_v7 }
 0x403   :  { %v3798_v11 = vpop.eup %3797  ;;  %v2733_v13 = vadd.f32 1.0, %v3796_v14  ;;  %3817 = vpow2.f32 %v3160_v4  ;;  %v2381_v16 = vpop.xlane.xlu0 %2380  ;;  %v3158_v23 = vmul.f32 -1.442695, %v2486_v9 }
 0x404   :  { %v3800_v17 = vpop.eup %3799  ;;  %v2734_v18 = vadd.f32 1.0, %v3798_v11  ;;  %3819 = vpow2.f32 %v3157_v10  ;;  %v2491_v19 = vadd.f32 %v4863_v62, %v2381_v16  ;;  %v2384_v20 = vpop.xlane.xlu1 %2383 }
 0x405   :  { %v3802_v21 = vpop.eup %3801  ;;  %3821 = vrcp.f32 %v2733_v13  ;;  %v2739_v22 = vadd.f32 1.0, %v3800_v17  ;;  %v2492_v27 = vadd.f32 %v4863_v62, %v2384_v20 }
 0x406   :  { %v3804_v24 = vpop.eup %3803  ;;  %3823 = vrcp.f32 %v2734_v18  ;;  %v2740_v25 = vadd.f32 1.0, %v3802_v21  ;;  %v3163_v26 = vmul.f32 -1.442695, %v2491_v19 }
 0x407   :  { %v3806_v28 = vpop.eup %3805  ;;  %2922 = vst.msk [vmem:[%s5189_s4 + $0xc0] sm:$0xff] %vm2897_vm6, %v3804_v24  ;;  %3825 = vrcp.f32 %v2739_v22  ;;  %v2375_v29 = vpop.xlane.xlu0 %2374  ;;  %v3164_v37 = vmul.f32 -1.442695, %v2492_v27 }
 0x408   :  { %v3808_v30 = vpop.eup %3807  ;;  %2923 = vst.msk [vmem:[%s5189_s4 + $0xc8] sm:$0xff] %vm2897_vm6, %v3806_v28  ;;  %3827 = vrcp.f32 %v2740_v25  ;;  %v2489_v31 = vadd.f32 %v4863_v62, %v2375_v29  ;;  %v2378_v32 = vpop.xlane.xlu1 %2377 }
 0x409   :  { %v3810_v33 = vpop.eup %3809  ;;  %v2737_v34 = vadd.f32 1.0, %v3808_v30  ;;  %3829 = vpow2.f32 %v3158_v23  ;;  %v2490_v61 = vadd.f32 %v4863_v62, %v2378_v32 }
 0x40a   :  { %v3812_v35 = vpop.eup %3811  ;;  %v2738_v36 = vadd.f32 1.0, %v3810_v33  ;;  %3831 = vpow2.f32 %v3163_v26  ;;  %v3161_v42 = vmul.f32 -1.442695, %v2489_v31 }
 0x40b   :  { %v3814_v40 = vpop.eup %3813  ;;  %3833 = vrcp.f32 %v2737_v34  ;;  %v2743_v41 = vadd.f32 1.0, %v3812_v35  ;;  %v2393_v44 = vpop.xlane.xlu0 %2392  ;;  %v3162_v52 = vmul.f32 -1.442695, %v2490_v61 }
 0x40c   :  { %v3816_v45 = vpop.eup %3815  ;;  %2928 = vst.msk [vmem:[%s5189_s4 + $0xf0] sm:$0xff] %vm2897_vm6, %v3814_v40  ;;  %3835 = vrcp.f32 %v2738_v36  ;;  %v2495_v46 = vadd.f32 %v4863_v62, %v2393_v44  ;;  %v2396_v47 = vpop.xlane.xlu1 %2395 }
 0x40d   :  { %v3818_v48 = vpop.eup %3817  ;;  %2929 = vst.msk [vmem:[%s5189_s4 + $0xf8] sm:$0xff] %vm2897_vm6, %v3816_v45  ;;  %3837 = vrcp.f32 %v2743_v41  ;;  %v2496_v49 = vadd.f32 %v4863_v62, %v2396_v47 }
 0x40e   :  { %v3820_v50 = vpop.eup %3819  ;;  %v2744_v51 = vadd.f32 1.0, %v3818_v48  ;;  %3839 = vpow2.f32 %v3164_v37  ;;  %v3167_v55 = vmul.f32 -1.442695, %v2495_v46 }
 0x40f   :  { %v3822_v53 = vpop.eup %3821  ;;  %v2741_v54 = vadd.f32 1.0, %v3820_v50  ;;  %3841 = vpow2.f32 %v3161_v42  ;;  %v2387_v56 = vpop.xlane.xlu0 %2386  ;;  %v3168_v39 = vmul.f32 -1.442695, %v2496_v49 }
 0x410   :  { %v3824_v57 = vpop.eup %3823  ;;  %2926 = vst.msk [vmem:[%s5189_s4 + $0xe0] sm:$0xff] %vm2897_vm6, %v3822_v53  ;;  %3843 = vrcp.f32 %v2744_v51  ;;  %v2493_v58 = vadd.f32 %v4863_v62, %v2387_v56  ;;  %v2390_v59 = vpop.xlane.xlu1 %2389 }
 0x411   :  { %v3826_v60 = vpop.eup %3825  ;;  %2927 = vst.msk [vmem:[%s5189_s4 + $0xe8] sm:$0xff] %vm2897_vm6, %v3824_v57  ;;  %3845 = vrcp.f32 %v2741_v54  ;;  %v2494_v63 = vadd.f32 %v4863_v62, %v2390_v59 }
 0x412   :  { %v3828_v0 = vpop.eup %3827  ;;  %2932 = vst.msk [vmem:[%s5189_s4 + $0x110] sm:$0xff] %vm2897_vm6, %v3826_v60  ;;  %3847 = vpow2.f32 %v3162_v52  ;;  %v3165_v15 = vmul.f32 -1.442695, %v2493_v58 }
 0x413   :  { %v3830_v1 = vpop.eup %3829  ;;  %2933 = vst.msk [vmem:[%s5189_s4 + $0x118] sm:$0xff] %vm2897_vm6, %v3828_v0  ;;  %3849 = vpow2.f32 %v3167_v55  ;;  %v2405_v2 = vpop.xlane.xlu0 %2404  ;;  %v3166_v4 = vmul.f32 -1.442695, %v2494_v63 }
 0x414   :  { %v3832_v43 = vpop.eup %3831  ;;  %v2742_v3 = vadd.f32 1.0, %v3830_v1  ;;  %3851 = vpow2.f32 %v3168_v39  ;;  %v2499_v5 = vadd.f32 %v4863_v62, %v2405_v2  ;;  %v2408_v6 = vpop.xlane.xlu1 %2407 }
 0x415   :  { %v3834_v12 = vpop.eup %3833  ;;  %v2747_v7 = vadd.f32 1.0, %v3832_v43  ;;  %3853 = vpow2.f32 %v3165_v15  ;;  %v2500_v38 = vadd.f32 %v4863_v62, %v2408_v6 }
 0x416   :  { %v3836_v8 = vpop.eup %3835  ;;  %2930 = vst.msk [vmem:[%s5189_s4 + $0x100] sm:$0xff] %vm2897_vm6, %v3834_v12  ;;  %3855 = vrcp.f32 %v2742_v3  ;;  %v3171_v9 = vmul.f32 -1.442695, %v2499_v5 }
 0x417   :  { %v3838_v14 = vpop.eup %3837  ;;  %2931 = vst.msk [vmem:[%s5189_s4 + $0x108] sm:$0xff] %vm2897_vm6, %v3836_v8  ;;  %3857 = vrcp.f32 %v2747_v7  ;;  %v3172_v10 = vmul.f32 -1.442695, %v2500_v38  ;;  %v2399_v11 = vpop.xlane.xlu0 %2398 }
 0x418   :  { %v3840_v13 = vpop.eup %3839  ;;  %2936 = vst.msk [vmem:[%s5189_s4 + $0x130] sm:$0xff] %vm2897_vm6, %v3838_v14  ;;  %3859 = vpow2.f32 %v3166_v4  ;;  %v2497_v16 = vadd.f32 %v4863_v62, %v2399_v11  ;;  %v2402_v17 = vpop.xlane.xlu1 %2401 }
 0x419   :  { %v3842_v18 = vpop.eup %3841  ;;  %v2748_v19 = vadd.f32 1.0, %v3840_v13  ;;  %3861 = vpow2.f32 %v3171_v9  ;;  %v2498_v20 = vadd.f32 %v4863_v62, %v2402_v17 }
 0x41a   :  { %v3844_v21 = vpop.eup %3843  ;;  %v2745_v22 = vadd.f32 1.0, %v3842_v18  ;;  %3863 = vpow2.f32 %v3172_v10  ;;  %v3169_v23 = vmul.f32 -1.442695, %v2497_v16 }
 0x41b   :  { %v3846_v24 = vpop.eup %3845  ;;  %2937 = vst.msk [vmem:[%s5189_s4 + $0x138] sm:$0xff] %vm2897_vm6, %v3844_v21  ;;  %3865 = vrcp.f32 %v2748_v19  ;;  %v3170_v25 = vmul.f32 -1.442695, %v2498_v20  ;;  %v2417_v26 = vpop.xlane.xlu0 %2416 }
 0x41c   :  { %v3848_v27 = vpop.eup %3847  ;;  %2934 = vst.msk [vmem:[%s5189_s4 + $0x120] sm:$0xff] %vm2897_vm6, %v3846_v24  ;;  %3867 = vrcp.f32 %v2745_v22  ;;  %v2503_v28 = vadd.f32 %v4863_v62, %v2417_v26  ;;  %v2420_v29 = vpop.xlane.xlu1 %2419 }
 0x41d   :  { %v3850_v30 = vpop.eup %3849  ;;  %v2746_v31 = vadd.f32 1.0, %v3848_v27  ;;  %3869 = vpow2.f32 %v3169_v23  ;;  %v2504_v32 = vadd.f32 %v4863_v62, %v2420_v29 }
 0x41e   :  { %v3852_v33 = vpop.eup %3851  ;;  %v2751_v34 = vadd.f32 1.0, %v3850_v30  ;;  %3871 = vpow2.f32 %v3170_v25  ;;  %v3175_v37 = vmul.f32 -1.442695, %v2503_v28 }
 0x41f   :  { %v3854_v35 = vpop.eup %3853  ;;  %3873 = vrcp.f32 %v2746_v31  ;;  %v2752_v36 = vadd.f32 1.0, %v3852_v33  ;;  %v2411_v61 = vpop.xlane.xlu0 %2410  ;;  %v3176_v42 = vmul.f32 -1.442695, %v2504_v32 }
 0x420   :  { %v3856_v40 = vpop.eup %3855  ;;  %3875 = vrcp.f32 %v2751_v34  ;;  %v2749_v41 = vadd.f32 1.0, %v3854_v35  ;;  %v2501_v44 = vadd.f32 %v4863_v62, %v2411_v61  ;;  %v2414_v45 = vpop.xlane.xlu1 %2413 }
 0x421   :  { %v3858_v46 = vpop.eup %3857  ;;  %2935 = vst.msk [vmem:[%s5189_s4 + $0x128] sm:$0xff] %vm2897_vm6, %v3856_v40  ;;  %3877 = vrcp.f32 %v2752_v36  ;;  %v2502_v47 = vadd.f32 %v4863_v62, %v2414_v45 }
 0x422   :  { %v3860_v48 = vpop.eup %3859  ;;  %2940 = vst.msk [vmem:[%s5189_s4 + $0x150] sm:$0xff] %vm2897_vm6, %v3858_v46  ;;  %3879 = vrcp.f32 %v2749_v41  ;;  %v3173_v54 = vmul.f32 -1.442695, %v2501_v44 }
 0x423   :  { %v3862_v49 = vpop.eup %3861  ;;  %v2750_v50 = vadd.f32 1.0, %v3860_v48  ;;  %3881 = vpow2.f32 %v3175_v37  ;;  %v2429_v51 = vpop.xlane.xlu0 %2428  ;;  %v3174_v58 = vmul.f32 -1.442695, %v2502_v47 }
 0x424   :  { %v3864_v52 = vpop.eup %3863  ;;  %v2755_v53 = vadd.f32 1.0, %v3862_v49  ;;  %3883 = vpow2.f32 %v3176_v42  ;;  %v2507_v55 = vadd.f32 %v4863_v62, %v2429_v51  ;;  %v2432_v56 = vpop.xlane.xlu1 %2431 }
 0x425   :  { %v3866_v57 = vpop.eup %3865  ;;  %3885 = vrcp.f32 %v2750_v50  ;;  %v2756_v39 = vadd.f32 1.0, %v3864_v52  ;;  %v2508_v59 = vadd.f32 %v4863_v62, %v2432_v56 }
 0x426   :  { %v3868_v60 = vpop.eup %3867  ;;  %2941 = vst.msk [vmem:[%s5189_s4 + $0x158] sm:$0xff] %vm2897_vm6, %v3866_v57  ;;  %3887 = vrcp.f32 %v2755_v53  ;;  %v3179_v2 = vmul.f32 -1.442695, %v2507_v55 }
 0x427   :  { %v3870_v63 = vpop.eup %3869  ;;  %2938 = vst.msk [vmem:[%s5189_s4 + $0x140] sm:$0xff] %vm2897_vm6, %v3868_v60  ;;  %3889 = vrcp.f32 %v2756_v39  ;;  %v2423_v0 = vpop.xlane.xlu0 %2422  ;;  %v3180_v6 = vmul.f32 -1.442695, %v2508_v59 }
 0x428   :  { %v3872_v15 = vpop.eup %3871  ;;  %v2753_v1 = vadd.f32 1.0, %v3870_v63  ;;  %3891 = vpow2.f32 %v3173_v54  ;;  %v2505_v43 = vadd.f32 %v4863_v62, %v2423_v0  ;;  %v2426_v3 = vpop.xlane.xlu1 %2425 }
 0x429   :  { %v3874_v4 = vpop.eup %3873  ;;  %v2754_v5 = vadd.f32 1.0, %v3872_v15  ;;  %3893 = vpow2.f32 %v3174_v58  ;;  %v2506_v12 = vadd.f32 %v4863_v62, %v2426_v3 }
 0x42a   :  { %v3876_v7 = vpop.eup %3875  ;;  %2939 = vst.msk [vmem:[%s5189_s4 + $0x148] sm:$0xff] %vm2897_vm6, %v3874_v4  ;;  %3895 = vrcp.f32 %v2753_v1  ;;  %v3177_v38 = vmul.f32 -1.442695, %v2505_v43 }
 0x42b   :  { %v3878_v8 = vpop.eup %3877  ;;  %2944 = vst.msk [vmem:[%s5189_s4 + $0x170] sm:$0xff] %vm2897_vm6, %v3876_v7  ;;  %3897 = vrcp.f32 %v2754_v5  ;;  %v3178_v9 = vmul.f32 -1.442695, %v2506_v12  ;;  %v2435_v14 = vpop.xlane.xlu0 %2434 }
 0x42c   :  { %v3880_v10 = vpop.eup %3879  ;;  %2945 = vst.msk [vmem:[%s5189_s4 + $0x178] sm:$0xff] %vm2897_vm6, %v3878_v8  ;;  %3899 = vpow2.f32 %v3179_v2  ;;  %v2509_v11 = vadd.f32 %v4863_v62, %v2435_v14 }
 0x42d   :  { %v3882_v13 = vpop.eup %3881  ;;  %2942 = vst.msk [vmem:[%s5189_s4 + $0x160] sm:$0xff] %vm2897_vm6, %v3880_v10  ;;  %3901 = vpow2.f32 %v3180_v6  ;;  %v2438_v16 = vpop.xlane.xlu1 %2437 }
 0x42e   :  { %v3884_v17 = vpop.eup %3883  ;;  %v2759_v18 = vadd.f32 1.0, %v3882_v13  ;;  %3903 = vpow2.f32 %v3177_v38  ;;  %v3181_v19 = vmul.f32 -1.442695, %v2509_v11  ;;  %v2510_v20 = vadd.f32 %v4863_v62, %v2438_v16 }
 0x42f   :  { %v3886_v21 = vpop.eup %3885  ;;  %v2760_v22 = vadd.f32 1.0, %v3884_v17  ;;  %3905 = vpow2.f32 %v3178_v9  ;;  %v2441_v23 = vpop.xlane.xlu0 %2440 }
 0x430   :  { %v3888_v24 = vpop.eup %3887  ;;  %2943 = vst.msk [vmem:[%s5189_s4 + $0x168] sm:$0xff] %vm2897_vm6, %v3886_v21  ;;  %3907 = vrcp.f32 %v2759_v18  ;;  %v3182_v25 = vmul.f32 -1.442695, %v2510_v20  ;;  %v2511_v26 = vadd.f32 %v4863_v62, %v2441_v23 }
 0x431   :  { %v3890_v27 = vpop.eup %3889  ;;  %2948 = vst.msk [vmem:[%s5189_s4 + $0x190] sm:$0xff] %vm2897_vm6, %v3888_v24  ;;  %3909 = vrcp.f32 %v2760_v22  ;;  %v2444_v28 = vpop.xlane.xlu1 %2443 }
 0x432   :  { %v3892_v29 = vpop.eup %3891  ;;  %2949 = vst.msk [vmem:[%s5189_s4 + $0x198] sm:$0xff] %vm2897_vm6, %v3890_v27  ;;  %3911 = vpow2.f32 %v3181_v19  ;;  %v3183_v30 = vmul.f32 -1.442695, %v2511_v26  ;;  %v2512_v31 = vadd.f32 %v4863_v62, %v2444_v28 }
 0x433   :  { %v3894_v32 = vpop.eup %3893  ;;  %v2757_v33 = vadd.f32 1.0, %v3892_v29  ;;  %3913 = vpow2.f32 %v3182_v25 }
 0x434   :  { %v3896_v34 = vpop.eup %3895  ;;  %v2758_v35 = vadd.f32 1.0, %v3894_v32  ;;  %3915 = vpow2.f32 %v3183_v30  ;;  %v3184_v36 = vmul.f32 -1.442695, %v2512_v31 }
 0x435   :  { %v3898_v37 = vpop.eup %3897  ;;  %2946 = vst.msk [vmem:[%s5189_s4 + $0x180] sm:$0xff] %vm2897_vm6, %v3896_v34  ;;  %3917 = vrcp.f32 %v2757_v33 }
 0x436   :  { %v3900_v61 = vpop.eup %3899  ;;  %2947 = vst.msk [vmem:[%s5189_s4 + $0x188] sm:$0xff] %vm2897_vm6, %v3898_v37  ;;  %3919 = vrcp.f32 %v2758_v35 }
 0x437   :  { %v3902_v62 = vpop.eup %3901  ;;  %v2763_v40 = vadd.f32 1.0, %v3900_v61  ;;  %3921 = vpow2.f32 %v3184_v36 }
 0x438   :  { %v3904_v41 = vpop.eup %3903  ;;  %v2764_v42 = vadd.f32 1.0, %v3902_v62 }
 0x439   :  { %v3906_v44 = vpop.eup %3905  ;;  %3923 = vrcp.f32 %v2763_v40  ;;  %v2761_v45 = vadd.f32 1.0, %v3904_v41 }
 0x43a   :  { %v3908_v46 = vpop.eup %3907  ;;  %3925 = vrcp.f32 %v2764_v42  ;;  %v2762_v47 = vadd.f32 1.0, %v3906_v44 }
 0x43b   :  { %v3910_v48 = vpop.eup %3909  ;;  %2952 = vst.msk [vmem:[%s5189_s4 + $0x1b0] sm:$0xff] %vm2897_vm6, %v3908_v46  ;;  %3927 = vrcp.f32 %v2761_v45 }
 0x43c   :  { %v3912_v49 = vpop.eup %3911  ;;  %2953 = vst.msk [vmem:[%s5189_s4 + $0x1b8] sm:$0xff] %vm2897_vm6, %v3910_v48  ;;  %3929 = vrcp.f32 %v2762_v47 }
 0x43d   :  { %v3914_v50 = vpop.eup %3913  ;;  %v2765_v51 = vadd.f32 1.0, %v3912_v49 }
 0x43e   :  { %v3916_v52 = vpop.eup %3915  ;;  %v2766_v53 = vadd.f32 1.0, %v3914_v50 }
 0x43f   :  { %v3918_v54 = vpop.eup %3917  ;;  %3931 = vrcp.f32 %v2765_v51  ;;  %v2767_v55 = vadd.f32 1.0, %v3916_v52 }
 0x440   :  { %v3920_v56 = vpop.eup %3919  ;;  %2950 = vst.msk [vmem:[%s5189_s4 + $0x1a0] sm:$0xff] %vm2897_vm6, %v3918_v54  ;;  %3933 = vrcp.f32 %v2766_v53 }
 0x441   :  { %v3922_v57 = vpop.eup %3921  ;;  %2951 = vst.msk [vmem:[%s5189_s4 + $0x1a8] sm:$0xff] %vm2897_vm6, %v3920_v56  ;;  %3935 = vrcp.f32 %v2767_v55 }
 0x442   :  { %v2768_v39 = vadd.f32 1.0, %v3922_v57 }
 0x443   :  { %v3924_v58 = vpop.eup %3923 }
 0x444   :  { %v3926_v59 = vpop.eup %3925  ;;  %2956 = vst.msk [vmem:[%s5189_s4 + $0x1d0] sm:$0xff] %vm2897_vm6, %v3924_v58  ;;  %3937 = vrcp.f32 %v2768_v39 }
 0x445   :  { %v3928_v60 = vpop.eup %3927  ;;  %2957 = vst.msk [vmem:[%s5189_s4 + $0x1d8] sm:$0xff] %vm2897_vm6, %v3926_v59 }
 0x446   :  { %v3930_v63 = vpop.eup %3929  ;;  %2954 = vst.msk [vmem:[%s5189_s4 + $0x1c0] sm:$0xff] %vm2897_vm6, %v3928_v60 }
 0x447   :  { %2955 = vst.msk [vmem:[%s5189_s4 + $0x1c8] sm:$0xff] %vm2897_vm6, %v3930_v63 }
 0x449   :  { %v3932_v0 = vpop.eup %3931 }
 0x44a   :  { %v3934_v15 = vpop.eup %3933  ;;  %2958 = vst.msk [vmem:[%s5189_s4 + $0x1e0] sm:$0xff] %vm2897_vm6, %v3932_v0 }
 0x44b   :  { %v3936_v1 = vpop.eup %3935  ;;  %2959 = vst.msk [vmem:[%s5189_s4 + $0x1e8] sm:$0xff] %vm2897_vm6, %v3934_v15 }
 0x44c   :  { %2960 = vst.msk [vmem:[%s5189_s4 + $0x1f0] sm:$0xff] %vm2897_vm6, %v3936_v1 }
 0x44e   :  { %v3938_v2 = vpop.eup %3937 }
 0x44f   :  { %2961 = vst.msk [vmem:[%s5189_s4 + $0x1f8] sm:$0xff] %vm2897_vm6, %v3938_v2 }

</bundles_post_ra>
